<compile_context>
chip_gen: v5e
topology: v5e:2x2
jax: 0.10.0
libtpu: 0.0.40
codegen_flags: <defaults>
</compile_context>

<pallas_src>
import functools

import jax
import jax.numpy as jnp
from jax.experimental import pallas as pl
from jax.experimental.pallas import tpu as pltpu

# ---- module hyperparameters (match nn.Module defaults) ----
DIM = 32
HEADS = 8
DIM_HEAD = 16
INNER = HEADS * DIM_HEAD          # 128
SCALE = DIM_HEAD ** (-0.5)

# ---- problem sizes for the demo run ----
BATCH = 2
SEQ = 8


def attention_kernel(x_ref, wqkv_ref, wout_ref, bout_ref, wg_ref, bg_ref,
                     gated_ref, attn_ref, *, bb):
    """One grid step processes `bb` batch elements.

    Weights arrive head-major from the wrapper, so every matmul is a
    batch-leading / contract-last einsum; no per-head lane slicing, no
    concatenation, no in-kernel relayout of activations.
    """
    # hoist shared weight/bias loads out of the batch loop
    w_qkv = wqkv_ref[...]          # (3*HEADS, DIM, DIM_HEAD)
    w_out = wout_ref[...]          # (HEADS, DIM_HEAD, DIM)
    b_out = bout_ref[...]          # (1, DIM)
    w_g = wg_ref[...]              # (DIM, DIM)
    b_g = bg_ref[...]              # (1, DIM)

    for b in range(bb):            # static unroll (bb in {1, 2})
        x = x_ref[b]               # (SEQ, DIM)

        # q/k/v for all heads in one batched matmul: broadcast x along the
        # (3*HEADS) major axis and contract DIM (last dim of lhs).
        xb = jnp.broadcast_to(x, (3 * HEADS, SEQ, DIM))
        qkv = jnp.einsum('hnd,hdk->hnk', xb, w_qkv,
                         preferred_element_type=jnp.float32)      # (3H, SEQ, Dh)
        q = qkv[0 * HEADS:1 * HEADS]    # (H, SEQ, Dh) -- major-axis slice, free
        k = qkv[1 * HEADS:2 * HEADS]
        v = qkv[2 * HEADS:3 * HEADS]

        # attention scores + softmax, batched over heads
        s = jnp.einsum('hid,hjd->hij', q, k,
                       preferred_element_type=jnp.float32) * SCALE  # (H, SEQ, SEQ)
        m = jnp.max(s, axis=-1, keepdims=True)
        e = jnp.exp(s - m)
        attn = e / jnp.sum(e, axis=-1, keepdims=True)
        attn_ref[b] = attn              # single store covering all heads

        # attention-weighted values, batched over heads
        o = jnp.einsum('hij,hjd->hid', attn, v,
                       preferred_element_type=jnp.float32)           # (H, SEQ, Dh)

        # to_out: per-head partial projections + cheap major-axis sum realizes
        # 'b h n d -> b n (h d)' followed by Linear(INNER, DIM) with no
        # lane-concat / relayout.
        partial = jnp.einsum('hnd,hdo->hno', o, w_out,
                             preferred_element_type=jnp.float32)      # (H, SEQ, DIM)
        proj = jnp.sum(partial, axis=0) + b_out                        # (SEQ, DIM)

        # Gating: proj * sigmoid(Linear(DIM, DIM)(proj))
        gate_logits = jnp.dot(proj, w_g,
                              preferred_element_type=jnp.float32) + b_g
        gated_ref[b] = proj * jax.nn.sigmoid(gate_logits)


def _grid_steps_for_device(batch):
    """v7x has 2 TensorCores/chip -> keep >= 2 parallel grid steps so both
    cores stay busy.  Single-TC v5e/v6e -> fold the whole batch into one grid
    step to avoid ~0.35us/step pipeline overhead on this latency-bound size."""
    try:
        kind = jax.devices()[0].device_kind.lower()
    except Exception:
        kind = ""
    dual_tc = "v7" in kind
    if dual_tc and batch > 1:
        return batch
    return 1


def attention_forward(x, w_qkv, w_out, b_out, w_gate, b_gate):
    B, N, D = x.shape
    assert D == DIM and N == SEQ

    grid_steps = _grid_steps_for_device(B)
    if B % grid_steps:
        grid_steps = B
    bb = B // grid_steps

    # Wrapper-side layout plumbing (one-time, outside the kernel):
    #   w_qkv: (DIM, 3*INNER), columns ordered [q | k | v], each head-major
    #          -> (3*HEADS, DIM, DIM_HEAD)
    w_qkv3 = (w_qkv.T.reshape(3, HEADS, DIM_HEAD, DIM)
              .transpose(0, 1, 3, 2)
              .reshape(3 * HEADS, DIM, DIM_HEAD))
    #   w_out: (INNER, DIM) with INNER ordered (h, d) -> (HEADS, DIM_HEAD, DIM)
    w_out3 = w_out.reshape(HEADS, DIM_HEAD, DIM)

    kernel = functools.partial(attention_kernel, bb=bb)

    gated, attn = pl.pallas_call(
        kernel,
        out_shape=(
            jax.ShapeDtypeStruct((B, N, DIM), jnp.float32),
            jax.ShapeDtypeStruct((B, HEADS, N, N), jnp.float32),
        ),
        grid_spec=pltpu.PrefetchScalarGridSpec(
            num_scalar_prefetch=0,
            grid=(grid_steps,),
            in_specs=[
                pl.BlockSpec((bb, N, DIM), lambda i: (i, 0, 0)),
                pl.BlockSpec((3 * HEADS, DIM, DIM_HEAD), lambda i: (0, 0, 0)),
                pl.BlockSpec((HEADS, DIM_HEAD, DIM), lambda i: (0, 0, 0)),
                pl.BlockSpec((1, DIM), lambda i: (0, 0)),
                pl.BlockSpec((DIM, DIM), lambda i: (0, 0)),
                pl.BlockSpec((1, DIM), lambda i: (0, 0)),
            ],
            out_specs=[
                pl.BlockSpec((bb, N, DIM), lambda i: (i, 0, 0)),
                pl.BlockSpec((bb, HEADS, N, N), lambda i: (i, 0, 0, 0)),
            ],
        ),
        compiler_params=pltpu.CompilerParams(
            dimension_semantics=("parallel",)),
    )(x, w_qkv3, w_out3, b_out, w_gate, b_gate)
    return gated, attn


def reference_forward(x, w_qkv, w_out, b_out, w_gate, b_gate):
    """Pure-JAX reference mirroring the PyTorch forward."""
    b, n, _ = x.shape
    qkv = x @ w_qkv                                        # (b, n, 3*INNER)
    q, k, v = jnp.split(qkv, 3, axis=-1)

    def to_heads(t):                                       # 'b n (h d) -> b h n d'
        return t.reshape(b, n, HEADS, DIM_HEAD).transpose(0, 2, 1, 3)

    q, k, v = map(to_heads, (q, k, v))
    scores = jnp.einsum('bhid,bhjd->bhij', q, k) * SCALE
    attn = jax.nn.softmax(scores, axis=-1)
    out = jnp.einsum('bhij,bhjd->bhid', attn, v)
    out = out.transpose(0, 2, 1, 3).reshape(b, n, INNER)   # 'b h n d -> b n (h d)'
    out = out @ w_out + b_out[0]
    coeff = jax.nn.sigmoid(out @ w_gate + b_gate[0])
    return out * coeff, attn


def init_params(key):
    """Deterministic init, roughly matching PyTorch Linear default ranges."""
    ks = jax.random.split(key, 5)

    def uniform(k, shape, fan_in):
        bound = 1.0 / (fan_in ** 0.5)
        return jax.random.uniform(k, shape, jnp.float32, -bound, bound)

    w_qkv = uniform(ks[0], (DIM, 3 * INNER), DIM)          # to_qkv (no bias)
    w_out = uniform(ks[1], (INNER, DIM), INNER)            # to_out weight
    b_out = uniform(ks[2], (1, DIM), INNER)                # to_out bias
    w_gate = uniform(ks[3], (DIM, DIM), DIM)               # gating weight
    b_gate = uniform(ks[4], (1, DIM), DIM)                 # gating bias
    return w_qkv, w_out, b_out, w_gate, b_gate


if __name__ == "__main__":
    key = jax.random.PRNGKey(0)
    k_x, k_p = jax.random.split(key)

    x = jax.random.normal(k_x, (BATCH, SEQ, DIM), jnp.float32)
    params = init_params(k_p)

    gated, attn = attention_forward(x, *params)
    gated = jax.block_until_ready(gated)
    attn = jax.block_until_ready(attn)

    # sanity check against pure-JAX reference
    ref_gated, ref_attn = reference_forward(x, *params)
    assert gated.shape == (BATCH, SEQ, DIM)
    assert attn.shape == (BATCH, HEADS, SEQ, SEQ)
    assert jnp.allclose(gated, ref_gated, atol=1e-5, rtol=1e-5)
    assert jnp.allclose(attn, ref_attn, atol=1e-5, rtol=1e-5)

    print("KERNEL_OK")
</pallas_src>

<mosaic_0001>
module attributes {stable_mosaic.version = 11 : i64} {
  func.func @attention_kernel(%arg0: i32, %arg1: memref<2x8x32xf32, #tpu.memory_space<vmem>>, %arg2: memref<24x32x16xf32, #tpu.memory_space<vmem>>, %arg3: memref<8x16x32xf32, #tpu.memory_space<vmem>>, %arg4: memref<1x32xf32, #tpu.memory_space<vmem>>, %arg5: memref<32x32xf32, #tpu.memory_space<vmem>>, %arg6: memref<1x32xf32, #tpu.memory_space<vmem>>, %arg7: memref<2x8x32xf32, #tpu.memory_space<vmem>>, %arg8: memref<2x8x8x8xf32, #tpu.memory_space<vmem>>) attributes {dimension_semantics = [#tpu.dimension_semantics<parallel>], iteration_bounds = array<i64: 1>, scalar_prefetch = 0 : i64, scratch_operands = 0 : i64, tpu.core_type = #tpu.core_type<tc>, window_params = [{transform_indices = @transform_0, window_bounds = array<i64: 2, 8, 32>}, {pipeline_mode = #tpu.pipeline_mode<synchronous>, transform_indices = @transform_1, window_bounds = array<i64: 24, 32, 16>}, {pipeline_mode = #tpu.pipeline_mode<synchronous>, transform_indices = @transform_2, window_bounds = array<i64: 8, 16, 32>}, {pipeline_mode = #tpu.pipeline_mode<synchronous>, transform_indices = @transform_3, window_bounds = array<i64: 1, 32>}, {pipeline_mode = #tpu.pipeline_mode<synchronous>, transform_indices = @transform_4, window_bounds = array<i64: 32, 32>}, {pipeline_mode = #tpu.pipeline_mode<synchronous>, transform_indices = @transform_5, window_bounds = array<i64: 1, 32>}, {transform_indices = @transform_6, window_bounds = array<i64: 2, 8, 32>}, {transform_indices = @transform_7, window_bounds = array<i64: 2, 8, 8, 8>}]} {
    %c0 = arith.constant 0 : index
    %c0_0 = arith.constant 0 : index
    %c0_1 = arith.constant 0 : index
    %0 = vector.load %arg2[%c0, %c0_0, %c0_1] : memref<24x32x16xf32, #tpu.memory_space<vmem>>, vector<24x32x16xf32>
    %c0_2 = arith.constant 0 : index
    %c0_3 = arith.constant 0 : index
    %c0_4 = arith.constant 0 : index
    %1 = vector.load %arg3[%c0_2, %c0_3, %c0_4] : memref<8x16x32xf32, #tpu.memory_space<vmem>>, vector<8x16x32xf32>
    %c0_5 = arith.constant 0 : index
    %c0_6 = arith.constant 0 : index
    %2 = vector.load %arg4[%c0_5, %c0_6] : memref<1x32xf32, #tpu.memory_space<vmem>>, vector<1x32xf32>
    %c0_7 = arith.constant 0 : index
    %c0_8 = arith.constant 0 : index
    %3 = vector.load %arg5[%c0_7, %c0_8] : memref<32x32xf32, #tpu.memory_space<vmem>>, vector<32x32xf32>
    %c0_9 = arith.constant 0 : index
    %c0_10 = arith.constant 0 : index
    %4 = vector.load %arg6[%c0_9, %c0_10] : memref<1x32xf32, #tpu.memory_space<vmem>>, vector<1x32xf32>
    %c0_11 = arith.constant 0 : index
    %c0_12 = arith.constant 0 : index
    %c0_13 = arith.constant 0 : index
    %5 = vector.load %arg1[%c0_11, %c0_12, %c0_13] : memref<2x8x32xf32, #tpu.memory_space<vmem>>, vector<1x8x32xf32>
    %6 = vector.shape_cast %5 : vector<1x8x32xf32> to vector<8x32xf32>
    %7 = vector.shape_cast %6 : vector<8x32xf32> to vector<1x8x32xf32>
    %8 = vector.broadcast %7 : vector<1x8x32xf32> to vector<24x8x32xf32>
    "tpu.trace_start"() <{level = 10 : i32, message = "hnd,hdk->hnk"}> : () -> ()
    %cst = arith.constant dense<0.000000e+00> : vector<24x8x16xf32>
    %9 = tpu.matmul %8, %0, %cst {dimension_numbers = #tpu.dot_dimension_numbers<[2], [1], [1], [2], [0, 0, 0, 1, 1, 2], [0], [0]>} : vector<24x8x32xf32>, vector<24x32x16xf32>, vector<24x8x16xf32> -> vector<24x8x16xf32>
    "tpu.trace_stop"() : () -> ()
    %10 = vector.extract_strided_slice %9 {offsets = [0, 0, 0], sizes = [8, 8, 16], strides = [1, 1, 1]} : vector<24x8x16xf32> to vector<8x8x16xf32>
    %11 = vector.extract_strided_slice %9 {offsets = [8, 0, 0], sizes = [8, 8, 16], strides = [1, 1, 1]} : vector<24x8x16xf32> to vector<8x8x16xf32>
    %12 = vector.extract_strided_slice %9 {offsets = [16, 0, 0], sizes = [8, 8, 16], strides = [1, 1, 1]} : vector<24x8x16xf32> to vector<8x8x16xf32>
    "tpu.trace_start"() <{level = 10 : i32, message = "hid,hjd->hij"}> : () -> ()
    %cst_14 = arith.constant dense<0.000000e+00> : vector<8x8x8xf32>
    %13 = tpu.matmul %10, %11, %cst_14 {dimension_numbers = #tpu.dot_dimension_numbers<[2], [2], [1], [1], [0, 0, 0, 1, 1, 1], [0], [0]>} : vector<8x8x16xf32>, vector<8x8x16xf32>, vector<8x8x8xf32> -> vector<8x8x8xf32>
    "tpu.trace_stop"() : () -> ()
    %cst_15 = arith.constant 2.500000e-01 : f32
    %14 = vector.broadcast %cst_15 : f32 to vector<8x8x8xf32>
    %15 = arith.mulf %13, %14 : vector<8x8x8xf32>
    %cst_16 = arith.constant dense<0xFF800000> : vector<8x8xf32>
    %16 = vector.multi_reduction <maximumf>, %15, %cst_16 [2] : vector<8x8x8xf32> to vector<8x8xf32>
    %17 = vector.shape_cast %16 : vector<8x8xf32> to vector<8x8x1xf32>
    %18 = vector.broadcast %17 : vector<8x8x1xf32> to vector<8x8x8xf32>
    %19 = arith.subf %15, %18 : vector<8x8x8xf32>
    %20 = math.exp %19 : vector<8x8x8xf32>
    %cst_17 = arith.constant dense<0.000000e+00> : vector<8x8xf32>
    %21 = vector.multi_reduction <add>, %20, %cst_17 [2] : vector<8x8x8xf32> to vector<8x8xf32>
    %22 = vector.shape_cast %21 : vector<8x8xf32> to vector<8x8x1xf32>
    %23 = vector.broadcast %22 : vector<8x8x1xf32> to vector<8x8x8xf32>
    %24 = arith.divf %20, %23 : vector<8x8x8xf32>
    %c0_18 = arith.constant 0 : index
    %c0_19 = arith.constant 0 : index
    %c0_20 = arith.constant 0 : index
    %c0_21 = arith.constant 0 : index
    %25 = vector.load %arg8[%c0_18, %c0_19, %c0_20, %c0_21] : memref<2x8x8x8xf32, #tpu.memory_space<vmem>>, vector<1x8x8x8xf32>
    %26 = vector.shape_cast %25 : vector<1x8x8x8xf32> to vector<8x8x8xf32>
    %27 = vector.shape_cast %24 : vector<8x8x8xf32> to vector<1x8x8x8xf32>
    tpu.vector_store %arg8[%c0_18, %c0_19, %c0_20, %c0_21], %27 {strides = array<i32>} : memref<2x8x8x8xf32, #tpu.memory_space<vmem>>, vector<1x8x8x8xf32>,
    "tpu.trace_start"() <{level = 10 : i32, message = "hij,hjd->hid"}> : () -> ()
    %cst_22 = arith.constant dense<0.000000e+00> : vector<8x8x16xf32>
    %28 = tpu.matmul %24, %12, %cst_22 {dimension_numbers = #tpu.dot_dimension_numbers<[2], [1], [1], [2], [0, 0, 0, 1, 1, 2], [0], [0]>} : vector<8x8x8xf32>, vector<8x8x16xf32>, vector<8x8x16xf32> -> vector<8x8x16xf32>
    "tpu.trace_stop"() : () -> ()
    "tpu.trace_start"() <{level = 10 : i32, message = "hnd,hdo->hno"}> : () -> ()
    %cst_23 = arith.constant dense<0.000000e+00> : vector<8x8x32xf32>
    %29 = tpu.matmul %28, %1, %cst_23 {dimension_numbers = #tpu.dot_dimension_numbers<[2], [1], [1], [2], [0, 0, 0, 1, 1, 2], [0], [0]>} : vector<8x8x16xf32>, vector<8x16x32xf32>, vector<8x8x32xf32> -> vector<8x8x32xf32>
    "tpu.trace_stop"() : () -> ()
    %cst_24 = arith.constant dense<0.000000e+00> : vector<8x32xf32>
    %30 = vector.multi_reduction <add>, %29, %cst_24 [0] : vector<8x8x32xf32> to vector<8x32xf32>
    %31 = vector.broadcast %2 : vector<1x32xf32> to vector<8x32xf32>
    %32 = arith.addf %30, %31 : vector<8x32xf32>
    %cst_25 = arith.constant dense<0.000000e+00> : vector<8x32xf32>
    %33 = tpu.matmul %32, %3, %cst_25 {dimension_numbers = #tpu.dot_dimension_numbers<[1], [0], [0], [1], [0, 0, 1, 1], [], []>} : vector<8x32xf32>, vector<32x32xf32>, vector<8x32xf32> -> vector<8x32xf32>
    %34 = vector.broadcast %4 : vector<1x32xf32> to vector<8x32xf32>
    %35 = arith.addf %33, %34 : vector<8x32xf32>
    %36 = arith.negf %35 : vector<8x32xf32>
    %37 = math.exp %36 : vector<8x32xf32>
    %cst_26 = arith.constant 1.000000e+00 : f32
    %38 = vector.broadcast %cst_26 : f32 to vector<8x32xf32>
    %39 = arith.addf %38, %37 : vector<8x32xf32>
    %40 = arith.divf %38, %39 : vector<8x32xf32>
    %41 = arith.mulf %32, %40 : vector<8x32xf32>
    %c0_27 = arith.constant 0 : index
    %c0_28 = arith.constant 0 : index
    %c0_29 = arith.constant 0 : index
    %42 = vector.load %arg7[%c0_27, %c0_28, %c0_29] : memref<2x8x32xf32, #tpu.memory_space<vmem>>, vector<1x8x32xf32>
    %43 = vector.shape_cast %42 : vector<1x8x32xf32> to vector<8x32xf32>
    %44 = vector.shape_cast %41 : vector<8x32xf32> to vector<1x8x32xf32>
    tpu.vector_store %arg7[%c0_27, %c0_28, %c0_29], %44 {strides = array<i32>} : memref<2x8x32xf32, #tpu.memory_space<vmem>>, vector<1x8x32xf32>,
    %c1 = arith.constant 1 : index
    %c0_30 = arith.constant 0 : index
    %c0_31 = arith.constant 0 : index
    %45 = vector.load %arg1[%c1, %c0_30, %c0_31] : memref<2x8x32xf32, #tpu.memory_space<vmem>>, vector<1x8x32xf32>
    %46 = vector.shape_cast %45 : vector<1x8x32xf32> to vector<8x32xf32>
    %47 = vector.shape_cast %46 : vector<8x32xf32> to vector<1x8x32xf32>
    %48 = vector.broadcast %47 : vector<1x8x32xf32> to vector<24x8x32xf32>
    "tpu.trace_start"() <{level = 10 : i32, message = "hnd,hdk->hnk"}> : () -> ()
    %cst_32 = arith.constant dense<0.000000e+00> : vector<24x8x16xf32>
    %49 = tpu.matmul %48, %0, %cst_32 {dimension_numbers = #tpu.dot_dimension_numbers<[2], [1], [1], [2], [0, 0, 0, 1, 1, 2], [0], [0]>} : vector<24x8x32xf32>, vector<24x32x16xf32>, vector<24x8x16xf32> -> vector<24x8x16xf32>
    "tpu.trace_stop"() : () -> ()
    %50 = vector.extract_strided_slice %49 {offsets = [0, 0, 0], sizes = [8, 8, 16], strides = [1, 1, 1]} : vector<24x8x16xf32> to vector<8x8x16xf32>
    %51 = vector.extract_strided_slice %49 {offsets = [8, 0, 0], sizes = [8, 8, 16], strides = [1, 1, 1]} : vector<24x8x16xf32> to vector<8x8x16xf32>
    %52 = vector.extract_strided_slice %49 {offsets = [16, 0, 0], sizes = [8, 8, 16], strides = [1, 1, 1]} : vector<24x8x16xf32> to vector<8x8x16xf32>
    "tpu.trace_start"() <{level = 10 : i32, message = "hid,hjd->hij"}> : () -> ()
    %cst_33 = arith.constant dense<0.000000e+00> : vector<8x8x8xf32>
    %53 = tpu.matmul %50, %51, %cst_33 {dimension_numbers = #tpu.dot_dimension_numbers<[2], [2], [1], [1], [0, 0, 0, 1, 1, 1], [0], [0]>} : vector<8x8x16xf32>, vector<8x8x16xf32>, vector<8x8x8xf32> -> vector<8x8x8xf32>
    "tpu.trace_stop"() : () -> ()
    %cst_34 = arith.constant 2.500000e-01 : f32
    %54 = vector.broadcast %cst_34 : f32 to vector<8x8x8xf32>
    %55 = arith.mulf %53, %54 : vector<8x8x8xf32>
    %cst_35 = arith.constant dense<0xFF800000> : vector<8x8xf32>
    %56 = vector.multi_reduction <maximumf>, %55, %cst_35 [2] : vector<8x8x8xf32> to vector<8x8xf32>
    %57 = vector.shape_cast %56 : vector<8x8xf32> to vector<8x8x1xf32>
    %58 = vector.broadcast %57 : vector<8x8x1xf32> to vector<8x8x8xf32>
    %59 = arith.subf %55, %58 : vector<8x8x8xf32>
    %60 = math.exp %59 : vector<8x8x8xf32>
    %cst_36 = arith.constant dense<0.000000e+00> : vector<8x8xf32>
    %61 = vector.multi_reduction <add>, %60, %cst_36 [2] : vector<8x8x8xf32> to vector<8x8xf32>
    %62 = vector.shape_cast %61 : vector<8x8xf32> to vector<8x8x1xf32>
    %63 = vector.broadcast %62 : vector<8x8x1xf32> to vector<8x8x8xf32>
    %64 = arith.divf %60, %63 : vector<8x8x8xf32>
    %c1_37 = arith.constant 1 : index
    %c0_38 = arith.constant 0 : index
    %c0_39 = arith.constant 0 : index
    %c0_40 = arith.constant 0 : index
    %65 = vector.load %arg8[%c1_37, %c0_38, %c0_39, %c0_40] : memref<2x8x8x8xf32, #tpu.memory_space<vmem>>, vector<1x8x8x8xf32>
    %66 = vector.shape_cast %65 : vector<1x8x8x8xf32> to vector<8x8x8xf32>
    %67 = vector.shape_cast %64 : vector<8x8x8xf32> to vector<1x8x8x8xf32>
    tpu.vector_store %arg8[%c1_37, %c0_38, %c0_39, %c0_40], %67 {strides = array<i32>} : memref<2x8x8x8xf32, #tpu.memory_space<vmem>>, vector<1x8x8x8xf32>,
    "tpu.trace_start"() <{level = 10 : i32, message = "hij,hjd->hid"}> : () -> ()
    %cst_41 = arith.constant dense<0.000000e+00> : vector<8x8x16xf32>
    %68 = tpu.matmul %64, %52, %cst_41 {dimension_numbers = #tpu.dot_dimension_numbers<[2], [1], [1], [2], [0, 0, 0, 1, 1, 2], [0], [0]>} : vector<8x8x8xf32>, vector<8x8x16xf32>, vector<8x8x16xf32> -> vector<8x8x16xf32>
    "tpu.trace_stop"() : () -> ()
    "tpu.trace_start"() <{level = 10 : i32, message = "hnd,hdo->hno"}> : () -> ()
    %cst_42 = arith.constant dense<0.000000e+00> : vector<8x8x32xf32>
    %69 = tpu.matmul %68, %1, %cst_42 {dimension_numbers = #tpu.dot_dimension_numbers<[2], [1], [1], [2], [0, 0, 0, 1, 1, 2], [0], [0]>} : vector<8x8x16xf32>, vector<8x16x32xf32>, vector<8x8x32xf32> -> vector<8x8x32xf32>
    "tpu.trace_stop"() : () -> ()
    %cst_43 = arith.constant dense<0.000000e+00> : vector<8x32xf32>
    %70 = vector.multi_reduction <add>, %69, %cst_43 [0] : vector<8x8x32xf32> to vector<8x32xf32>
    %71 = vector.broadcast %2 : vector<1x32xf32> to vector<8x32xf32>
    %72 = arith.addf %70, %71 : vector<8x32xf32>
    %cst_44 = arith.constant dense<0.000000e+00> : vector<8x32xf32>
    %73 = tpu.matmul %72, %3, %cst_44 {dimension_numbers = #tpu.dot_dimension_numbers<[1], [0], [0], [1], [0, 0, 1, 1], [], []>} : vector<8x32xf32>, vector<32x32xf32>, vector<8x32xf32> -> vector<8x32xf32>
    %74 = vector.broadcast %4 : vector<1x32xf32> to vector<8x32xf32>
    %75 = arith.addf %73, %74 : vector<8x32xf32>
    %76 = arith.negf %75 : vector<8x32xf32>
    %77 = math.exp %76 : vector<8x32xf32>
    %cst_45 = arith.constant 1.000000e+00 : f32
    %78 = vector.broadcast %cst_45 : f32 to vector<8x32xf32>
    %79 = arith.addf %78, %77 : vector<8x32xf32>
    %80 = arith.divf %78, %79 : vector<8x32xf32>
    %81 = arith.mulf %72, %80 : vector<8x32xf32>
    %c1_46 = arith.constant 1 : index
    %c0_47 = arith.constant 0 : index
    %c0_48 = arith.constant 0 : index
    %82 = vector.load %arg7[%c1_46, %c0_47, %c0_48] : memref<2x8x32xf32, #tpu.memory_space<vmem>>, vector<1x8x32xf32>
    %83 = vector.shape_cast %82 : vector<1x8x32xf32> to vector<8x32xf32>
    %84 = vector.shape_cast %81 : vector<8x32xf32> to vector<1x8x32xf32>
    tpu.vector_store %arg7[%c1_46, %c0_47, %c0_48], %84 {strides = array<i32>} : memref<2x8x32xf32, #tpu.memory_space<vmem>>, vector<1x8x32xf32>,
    return
  }
  func.func @transform_0(%arg0: i32) -> (i32, i32, i32) {
    %c0_i32 = arith.constant 0 : i32
    %c0_i32_0 = arith.constant 0 : i32
    %c0_i32_1 = arith.constant 0 : i32
    return %arg0, %c0_i32, %c0_i32_0 : i32, i32, i32
  }
  func.func @transform_1(%arg0: i32) -> (i32, i32, i32) {
    %c0_i32 = arith.constant 0 : i32
    %c0_i32_0 = arith.constant 0 : i32
    %c0_i32_1 = arith.constant 0 : i32
    %c0_i32_2 = arith.constant 0 : i32
    return %c0_i32, %c0_i32_0, %c0_i32_1 : i32, i32, i32
  }
  func.func @transform_2(%arg0: i32) -> (i32, i32, i32) {
    %c0_i32 = arith.constant 0 : i32
    %c0_i32_0 = arith.constant 0 : i32
    %c0_i32_1 = arith.constant 0 : i32
    %c0_i32_2 = arith.constant 0 : i32
    return %c0_i32, %c0_i32_0, %c0_i32_1 : i32, i32, i32
  }
  func.func @transform_3(%arg0: i32) -> (i32, i32) {
    %c0_i32 = arith.constant 0 : i32
    %c0_i32_0 = arith.constant 0 : i32
    %c0_i32_1 = arith.constant 0 : i32
    return %c0_i32, %c0_i32_0 : i32, i32
  }
  func.func @transform_4(%arg0: i32) -> (i32, i32) {
    %c0_i32 = arith.constant 0 : i32
    %c0_i32_0 = arith.constant 0 : i32
    %c0_i32_1 = arith.constant 0 : i32
    return %c0_i32, %c0_i32_0 : i32, i32
  }
  func.func @transform_5(%arg0: i32) -> (i32, i32) {
    %c0_i32 = arith.constant 0 : i32
    %c0_i32_0 = arith.constant 0 : i32
    %c0_i32_1 = arith.constant 0 : i32
    return %c0_i32, %c0_i32_0 : i32, i32
  }
  func.func @transform_6(%arg0: i32) -> (i32, i32, i32) {
    %c0_i32 = arith.constant 0 : i32
    %c0_i32_0 = arith.constant 0 : i32
    %c0_i32_1 = arith.constant 0 : i32
    return %arg0, %c0_i32, %c0_i32_0 : i32, i32, i32
  }
  func.func @transform_7(%arg0: i32) -> (i32, i32, i32, i32) {
    %c0_i32 = arith.constant 0 : i32
    %c0_i32_0 = arith.constant 0 : i32
    %c0_i32_1 = arith.constant 0 : i32
    %c0_i32_2 = arith.constant 0 : i32
    return %arg0, %c0_i32, %c0_i32_0, %c0_i32_1 : i32, i32, i32, i32
  }
}

</mosaic_0001>

<bundles_post_ra>
// kernel: tpu_custom_call.1
= control target key start
LH: loop header
LB: loop body
LE: loop exit
PB: predicated region body
PF: predicated region fallthrough
CT: control target
= control target key end

     0   :  { %13 = vsyncpa [#allocation3], 0  ;;  %vm146_vm0 = vcmask 261120   ;;  %s4362_s0 = inlined_call_operand.vmem [shape: f32[2,8,32], index: 0, kind: input, shape index: {}]   ;;  %s4363_s1 = inlined_call_operand.vmem [shape: f32[24,32,16], index: 1, kind: input, shape index: {}]   ;;  %s4364_s2 = inlined_call_operand.vmem [shape: f32[8,16,32], index: 2, kind: input, shape index: {}]   ;;  %s4365_s3 = inlined_call_operand.vmem [shape: f32[1,32], index: 3, kind: input, shape index: {}]   ;;  %s4366_s4 = inlined_call_operand.vmem [shape: f32[32,32], index: 4, kind: input, shape index: {}]   ;;  %s4367_s5 = inlined_call_operand.vmem [shape: f32[1,32], index: 5, kind: input, shape index: {}]   ;;  %s4368_s6 = inlined_call_operand.hbm [shape: f32[2,8,32], index: 6, kind: output, shape index: {0}]   ;;  %s4369_s7 = inlined_call_operand.hbm [shape: f32[2,8,8,8], index: 7, kind: output, shape index: {1}]  }
   0x1   :  { %v30_v0 = vld [vmem:[%s4363_s1 + $0x18] sm:$0xff]  ;;  %v29_v4 = vld [vmem:[%s4363_s1 + $0x10] sm:$0xff]  ;;  %v28_v8 = vld [vmem:[%s4363_s1 + $0x8] sm:$0xff] }
   0x2   :  { %v34_v1 = vld [vmem:[%s4363_s1 + $0x38] sm:$0xff]  ;;  %162 = vmatpush.msra.mxu0 %v30_v0  ;;  %v33_v5 = vld [vmem:[%s4363_s1 + $0x30] sm:$0xff]  ;;  %v32_v9 = vld [vmem:[%s4363_s1 + $0x28] sm:$0xff] }
   0x3   :  { %v38_v2 = vld [vmem:[%s4363_s1 + $0x58] sm:$0xff]  ;;  %182 = vmatpush.msra.mxu1 %v34_v1  ;;  %v37_v6 = vld [vmem:[%s4363_s1 + $0x50] sm:$0xff]  ;;  %v36_v10 = vld [vmem:[%s4363_s1 + $0x48] sm:$0xff] }
   0x4   :  { %v42_v3 = vld [vmem:[%s4363_s1 + $0x78] sm:$0xff]  ;;  %202 = vmatpush.msra.mxu2 %v38_v2  ;;  %v41_v7 = vld [vmem:[%s4363_s1 + $0x70] sm:$0xff]  ;;  %163 = vmatpush.msra.mxu0 %v29_v4  ;;  %v40_v11 = vld [vmem:[%s4363_s1 + $0x68] sm:$0xff] }
   0x5   :  { %222 = vmatpush.msra.mxu3 %v42_v3  ;;  %183 = vmatpush.msra.mxu1 %v33_v5  ;;  %v27_v12 = vld [vmem:[%s4363_s1] sm:$0xff]  ;;  %v46_v17 = vld [vmem:[%s4363_s1 + $0x98] sm:$0xff]  ;;  %v45_v21 = vld [vmem:[%s4363_s1 + $0x90] sm:$0xff] }
   0x6   :  { %203 = vmatpush.msra.mxu2 %v37_v6  ;;  %v31_v13 = vld [vmem:[%s4363_s1 + $0x20] sm:$0xff]  ;;  %164 = vmatpush.msra.mxu0 %v28_v8  ;;  %v50_v18 = vld [vmem:[%s4363_s1 + $0xb8] sm:$0xff]  ;;  %v49_v22 = vld [vmem:[%s4363_s1 + $0xb0] sm:$0xff] }
   0x7   :  { %223 = vmatpush.msra.mxu3 %v41_v7  ;;  %184 = vmatpush.msra.mxu1 %v32_v9  ;;  %v35_v14 = vld [vmem:[%s4363_s1 + $0x40] sm:$0xff]  ;;  %v54_v19 = vld [vmem:[%s4363_s1 + $0xd8] sm:$0xff]  ;;  %v53_v23 = vld [vmem:[%s4363_s1 + $0xd0] sm:$0xff] }
   0x8   :  { %v39_v15 = vld [vmem:[%s4363_s1 + $0x60] sm:$0xff]  ;;  %204 = vmatpush.msra.mxu2 %v36_v10  ;;  %165 = vmatpush.msra.mxu0 %v27_v12  ;;  %v58_v20 = vld [vmem:[%s4363_s1 + $0xf8] sm:$0xff]  ;;  %v57_v24 = vld [vmem:[%s4363_s1 + $0xf0] sm:$0xff] }
   0x9   :  { %224 = vmatpush.msra.mxu3 %v40_v11  ;;  %v3245_v16 = vld [vmem:[%s4362_s0] sm:$0xff]  ;;  %185 = vmatpush.msra.mxu1 %v31_v13  ;;  %v44_v25 = vld [vmem:[%s4363_s1 + $0x88] sm:$0xff]  ;;  %v62_v33 = vld [vmem:[%s4363_s1 + $0x118] sm:$0xff] }
   0xa   :  { %205 = vmatpush.msra.mxu2 %v35_v14  ;;  %2849 = vmatmul.msk.f32.vlgmr.msra.gmra.mxu0 %vm146_vm0, %v3245_v16  ;;  %v48_v26 = vld [vmem:[%s4363_s1 + $0xa8] sm:$0xff]  ;;  %v43_v29 = vld [vmem:[%s4363_s1 + $0x80] sm:$0xff]  ;;  %v3309_v34 = vld [vmem:[%s4363_s1 + $0x138] sm:$0xff] }
   0xb   :  { %225 = vmatpush.msra.mxu3 %v39_v15  ;;  %2850 = vmatmul.msk.f32.vlgmr.msra.gmra.mxu1 %vm146_vm0, %v3245_v16  ;;  %v52_v27 = vld [vmem:[%s4363_s1 + $0xc8] sm:$0xff]  ;;  %v47_v30 = vld [vmem:[%s4363_s1 + $0xa0] sm:$0xff]  ;;  %v70_v35 = vld [vmem:[%s4363_s1 + $0x158] sm:$0xff] }
   0xc   :  { %2851 = vmatmul.msk.f32.vlgmr.msra.gmra.mxu2 %vm146_vm0, %v3245_v16  ;;  %2852 = vmatmul.msk.f32.vlgmr.msra.gmra.mxu3 %vm146_vm0, %v3245_v16  ;;  %v56_v28 = vld [vmem:[%s4363_s1 + $0xe8] sm:$0xff]  ;;  %v51_v31 = vld [vmem:[%s4363_s1 + $0xc0] sm:$0xff]  ;;  %v74_v36 = vld [vmem:[%s4363_s1 + $0x178] sm:$0xff] }
   0xd   :  { %242 = vmatpush.msrb.mxu0 %v46_v17  ;;  %262 = vmatpush.msrb.mxu1 %v50_v18  ;;  %v55_v32 = vld [vmem:[%s4363_s1 + $0xe0] sm:$0xff]  ;;  %v61_v37 = vld [vmem:[%s4363_s1 + $0x110] sm:$0xff]  ;;  %v60_v41 = vld [vmem:[%s4363_s1 + $0x108] sm:$0xff] }
   0xe   :  { %282 = vmatpush.msrb.mxu2 %v54_v19  ;;  %302 = vmatpush.msrb.mxu3 %v58_v20  ;;  %v3331_v38 = vld [vmem:[%s4363_s1 + $0x130] sm:$0xff]  ;;  %v3348_v42 = vld [vmem:[%s4363_s1 + $0x128] sm:$0xff] }
   0xf   :  { %243 = vmatpush.msrb.mxu0 %v45_v21  ;;  %263 = vmatpush.msrb.mxu1 %v49_v22  ;;  %v3337_v39 = vld [vmem:[%s4363_s1 + $0x150] sm:$0xff]  ;;  %v3353_v43 = vld [vmem:[%s4363_s1 + $0x148] sm:$0xff] }
  0x10   :  { %283 = vmatpush.msrb.mxu2 %v53_v23  ;;  %303 = vmatpush.msrb.mxu3 %v57_v24  ;;  %v73_v40 = vld [vmem:[%s4363_s1 + $0x170] sm:$0xff]  ;;  %v72_v44 = vld [vmem:[%s4363_s1 + $0x168] sm:$0xff] }
  0x11   :  { %244 = vmatpush.msrb.mxu0 %v44_v25  ;;  %264 = vmatpush.msrb.mxu1 %v48_v26 }
  0x12   :  { %284 = vmatpush.msrb.mxu2 %v52_v27  ;;  %304 = vmatpush.msrb.mxu3 %v56_v28 }
  0x13   :  { %245 = vmatpush.msrb.mxu0 %v43_v29  ;;  %265 = vmatpush.msrb.mxu1 %v47_v30 }
  0x14   :  { %285 = vmatpush.msrb.mxu2 %v51_v31  ;;  %305 = vmatpush.msrb.mxu3 %v55_v32 }
  0x15   :  { %2853 = vmatmul.msk.f32.vlgmr.msrb.gmra.mxu0 %vm146_vm0, %v3245_v16  ;;  %2854 = vmatmul.msk.f32.vlgmr.msrb.gmra.mxu1 %vm146_vm0, %v3245_v16 }
  0x16   :  { %2855 = vmatmul.msk.f32.vlgmr.msrb.gmra.mxu2 %vm146_vm0, %v3245_v16  ;;  %2856 = vmatmul.msk.f32.vlgmr.msrb.gmra.mxu3 %vm146_vm0, %v3245_v16 }
  0x17   :  { %322 = vmatpush.msra.mxu0 %v62_v33  ;;  %342 = vmatpush.msra.mxu1 %v3309_v34 }
  0x18   :  { %362 = vmatpush.msra.mxu2 %v70_v35  ;;  %382 = vmatpush.msra.mxu3 %v74_v36 }
  0x19   :  { %323 = vmatpush.msra.mxu0 %v61_v37  ;;  %343 = vmatpush.msra.mxu1 %v3331_v38 }
  0x1a   :  { %14 = vsyncpa [#allocation5], 0  ;;  %363 = vmatpush.msra.mxu2 %v3337_v39  ;;  %383 = vmatpush.msra.mxu3 %v73_v40  ;;  %v59_v45 = vld [vmem:[%s4363_s1 + $0x100] sm:$0xff]  ;;  %v3383_v49 = vld [vmem:[%s4363_s1 + $0x198] sm:$0xff]  ;;  %vm630_vm1 = vcmask 130048   ;;  %vm847_vm2 = vcmask 64512  }
  0x1b   :  { %v3366_v46 = vld [vmem:[%s4363_s1 + $0x120] sm:$0xff]  ;;  %324 = vmatpush.msra.mxu0 %v60_v41  ;;  %344 = vmatpush.msra.mxu1 %v3348_v42  ;;  %v3388_v50 = vld [vmem:[%s4363_s1 + $0x1d8] sm:$0xff]  ;;  %v3409_v53 = vld [vmem:[%s4363_s1 + $0x190] sm:$0xff]  ;;  %s2832_s20 = sshll.u32 %s4369_s7, 4  ;;  %s3151_s21 = smov 128   ;;  %s2833_s20 = int_to_ptr.hbm [resolvable:$true] %s2832_s20 }
  0x1c   :  { %v3372_v47 = vld [vmem:[%s4363_s1 + $0x140] sm:$0xff]  ;;  %364 = vmatpush.msra.mxu2 %v3353_v43  ;;  %384 = vmatpush.msra.mxu3 %v72_v44  ;;  %v90_v51 = vld [vmem:[%s4363_s1 + $0x1f8] sm:$0xff]  ;;  %v3414_v54 = vld [vmem:[%s4363_s1 + $0x1d0] sm:$0xff]  ;;  %s3152_s22 = smov 8   ;;  %s3153_s7 = smov [#allocation2]  }
  0x1d   :  { %v71_v48 = vld [vmem:[%s4363_s1 + $0x160] sm:$0xff]  ;;  %325 = vmatpush.msra.mxu0 %v59_v45  ;;  %345 = vmatpush.msra.mxu1 %v3366_v46  ;;  %v3400_v52 = vld [vmem:[%s4363_s1 + $0x1b8] sm:$0xff]  ;;  %v89_v55 = vld [vmem:[%s4363_s1 + $0x1f0] sm:$0xff]  ;;  %s2819_s25 = sshll.u32 %s4368_s6, 4  ;;  %s2820_s25 = int_to_ptr.hbm [resolvable:$true] %s2819_s25 }
  0x1e   :  { %365 = vmatpush.msra.mxu2 %v3372_v47  ;;  %385 = vmatpush.msra.mxu3 %v71_v48  ;;  %v3424_v56 = vld [vmem:[%s4363_s1 + $0x1b0] sm:$0xff]  ;;  %v3430_v57 = vld [vmem:[%s4363_s1 + $0x188] sm:$0xff]  ;;  %v3451_v61 = vld [vmem:[%s4363_s1 + $0x180] sm:$0xff] }
  0x1f   :  { %2857 = vmatmul.msk.f32.vlgmr.msra.gmra.mxu0 %vm146_vm0, %v3245_v16  ;;  %2858 = vmatmul.msk.f32.vlgmr.msra.gmra.mxu1 %vm146_vm0, %v3245_v16  ;;  %v3435_v58 = vld [vmem:[%s4363_s1 + $0x1c8] sm:$0xff]  ;;  %v3456_v62 = vld [vmem:[%s4363_s1 + $0x1c0] sm:$0xff]  ;;  %v3476_v1 = vld [vmem:[%s4363_s1 + $0x218] sm:$0xff] }
  0x20   :  { %2859 = vmatmul.msk.f32.vlgmr.msra.gmra.mxu2 %vm146_vm0, %v3245_v16  ;;  %2860 = vmatmul.msk.f32.vlgmr.msra.gmra.mxu3 %vm146_vm0, %v3245_v16  ;;  %v88_v59 = vld [vmem:[%s4363_s1 + $0x1e8] sm:$0xff]  ;;  %v87_v63 = vld [vmem:[%s4363_s1 + $0x1e0] sm:$0xff]  ;;  %v3481_v2 = vld [vmem:[%s4363_s1 + $0x238] sm:$0xff] }
  0x21   :  { %402 = vmatpush.msrb.mxu0 %v3383_v49  ;;  %442 = vmatpush.msrb.mxu2 %v3388_v50  ;;  %v3445_v60 = vld [vmem:[%s4363_s1 + $0x1a8] sm:$0xff]  ;;  %v3467_v0 = vld [vmem:[%s4363_s1 + $0x1a0] sm:$0xff]  ;;  %v3493_v3 = vld [vmem:[%s4363_s1 + $0x210] sm:$0xff] }
  0x22   :  { %462 = vmatpush.msrb.mxu3 %v90_v51  ;;  %422 = vmatpush.msrb.mxu1 %v3400_v52  ;;  %4385 = vst [vmem:[#allocation8_spill] sm:$0xff] %v3493_v3  ;;  %v3498_v4 = vld [vmem:[%s4363_s1 + $0x230] sm:$0xff]  ;;  %v3507_v5 = vld [vmem:[%s4363_s1 + $0x208] sm:$0xff]  ;;  %v3517_v7 = vld [vmem:[%s4363_s1 + $0x200] sm:$0xff] }
  0x23   :  { %403 = vmatpush.msrb.mxu0 %v3409_v53  ;;  %443 = vmatpush.msrb.mxu2 %v3414_v54  ;;  %4386 = vst [vmem:[#allocation9_spill] sm:$0xff] %v3507_v5  ;;  %v3512_v6 = vld [vmem:[%s4363_s1 + $0x228] sm:$0xff]  ;;  %v3524_v8 = vld [vmem:[%s4363_s1 + $0x220] sm:$0xff]  ;;  %v3529_v9 = vld [vmem:[%s4363_s1 + $0x258] sm:$0xff] }
  0x24   :  { %463 = vmatpush.msrb.mxu3 %v89_v55  ;;  %423 = vmatpush.msrb.mxu1 %v3424_v56  ;;  %4387 = vst [vmem:[#allocation10_spill] sm:$0xff] %v3517_v7  ;;  %v106_v10 = vld [vmem:[%s4363_s1 + $0x278] sm:$0xff]  ;;  %v3538_v11 = vld [vmem:[%s4363_s1 + $0x250] sm:$0xff]  ;;  %v3565_v15 = vld [vmem:[%s4363_s1 + $0x248] sm:$0xff] }
  0x25   :  { %404 = vmatpush.msrb.mxu0 %v3430_v57  ;;  %444 = vmatpush.msrb.mxu2 %v3435_v58  ;;  %v105_v12 = vld [vmem:[%s4363_s1 + $0x270] sm:$0xff]  ;;  %v3548_v13 = vld [vmem:[%s4363_s1 + $0x298] sm:$0xff]  ;;  %v104_v17 = vld [vmem:[%s4363_s1 + $0x268] sm:$0xff] }
  0x26   :  { %464 = vmatpush.msrb.mxu3 %v88_v59  ;;  %424 = vmatpush.msrb.mxu1 %v3445_v60  ;;  %4388 = vst [vmem:[#allocation11_spill] sm:$0xff] %v3548_v13  ;;  %v3553_v14 = vld [vmem:[%s4363_s1 + $0x2b8] sm:$0xff]  ;;  %v3573_v18 = vld [vmem:[%s4363_s1 + $0x290] sm:$0xff]  ;;  %v3586_v20 = vld [vmem:[%s4363_s1 + $0x240] sm:$0xff] }
  0x27   :  { %405 = vmatpush.msrb.mxu0 %v3451_v61  ;;  %445 = vmatpush.msrb.mxu2 %v3456_v62  ;;  %4389 = vst [vmem:[#allocation12_spill] sm:$0xff] %v3573_v18  ;;  %v3579_v19 = vld [vmem:[%s4363_s1 + $0x2b0] sm:$0xff]  ;;  %v103_v21 = vld [vmem:[%s4363_s1 + $0x260] sm:$0xff]  ;;  %v3594_v22 = vld [vmem:[%s4363_s1 + $0x288] sm:$0xff] }
  0x28   :  { %465 = vmatpush.msrb.mxu3 %v87_v63  ;;  %2861 = vmatmul.msk.f32.vlgmr.msrb.gmra.mxu0 %vm146_vm0, %v3245_v16  ;;  %4390 = vst [vmem:[#allocation13_spill] sm:$0xff] %v3579_v19  ;;  %v3600_v23 = vld [vmem:[%s4363_s1 + $0x2a8] sm:$0xff]  ;;  %v3605_v24 = vld [vmem:[%s4363_s1 + $0x280] sm:$0xff]  ;;  %v3617_v26 = vld [vmem:[%s4363_s1 + $0x2d8] sm:$0xff] }
  0x29   :  { %425 = vmatpush.msrb.mxu1 %v3467_v0  ;;  %2863 = vmatmul.msk.f32.vlgmr.msrb.gmra.mxu2 %vm146_vm0, %v3245_v16  ;;  %4391 = vst [vmem:[#allocation14_spill] sm:$0xff] %v3586_v20  ;;  %v3610_v25 = vld [vmem:[%s4363_s1 + $0x2a0] sm:$0xff]  ;;  %v122_v27 = vld [vmem:[%s4363_s1 + $0x2f8] sm:$0xff]  ;;  %v3631_v28 = vld [vmem:[%s4363_s1 + $0x2d0] sm:$0xff] }
  0x2a   :  { %2864 = vmatmul.msk.f32.vlgmr.msrb.gmra.mxu3 %vm146_vm0, %v3245_v16  ;;  %2862 = vmatmul.msk.f32.vlgmr.msrb.gmra.mxu1 %vm146_vm0, %v3245_v16  ;;  %4392 = vst [vmem:[#allocation15_spill] sm:$0xff] %v3594_v22  ;;  %v121_v29 = vld [vmem:[%s4363_s1 + $0x2f0] sm:$0xff]  ;;  %v3645_v30 = vld [vmem:[%s4363_s1 + $0x2c8] sm:$0xff]  ;;  %v3654_v32 = vld [vmem:[%s4363_s1 + $0x2c0] sm:$0xff] }
  0x2b   :  { %482 = vmatpush.msra.mxu0 %v3476_v1  ;;  %502 = vmatpush.msra.mxu1 %v3481_v2  ;;  %4393 = vst [vmem:[#allocation16_spill] sm:$0xff] %v3600_v23  ;;  %v120_v31 = vld [vmem:[%s4363_s1 + $0x2e8] sm:$0xff]  ;;  %v119_v33 = vld [vmem:[%s4363_s1 + $0x2e0] sm:$0xff] }
  0x2c   :  { %522 = vmatpush.msra.mxu2 %v3529_v9  ;;  %542 = vmatpush.msra.mxu3 %v106_v10  ;;  %4394 = vst [vmem:[#allocation17_spill] sm:$0xff] %v3605_v24 }
  0x2d   :  { %483 = vmatpush.msra.mxu0 %v3493_v3  ;;  %503 = vmatpush.msra.mxu1 %v3498_v4  ;;  %4395 = vst [vmem:[#allocation18_spill] sm:$0xff] %v3610_v25 }
  0x2e   :  { %523 = vmatpush.msra.mxu2 %v3538_v11  ;;  %543 = vmatpush.msra.mxu3 %v105_v12  ;;  %4396 = vst [vmem:[#allocation19_spill] sm:$0xff] %v3617_v26 }
  0x2f   :  { %484 = vmatpush.msra.mxu0 %v3507_v5  ;;  %504 = vmatpush.msra.mxu1 %v3512_v6  ;;  %4397 = vst [vmem:[#allocation20_spill] sm:$0xff] %v3631_v28 }
  0x30   :  { %524 = vmatpush.msra.mxu2 %v3565_v15  ;;  %544 = vmatpush.msra.mxu3 %v104_v17  ;;  %4398 = vst [vmem:[#allocation21_spill] sm:$0xff] %v3645_v30 }
  0x31   :  { %485 = vmatpush.msra.mxu0 %v3517_v7  ;;  %505 = vmatpush.msra.mxu1 %v3524_v8  ;;  %4399 = vst [vmem:[#allocation22_spill] sm:$0xff] %v3654_v32 }
  0x32   :  { %2865 = vmatmul.msk.f32.vlgmr.msra.gmra.mxu0 %vm146_vm0, %v3245_v16  ;;  %2866 = vmatmul.msk.f32.vlgmr.msra.gmra.mxu1 %vm146_vm0, %v3245_v16 }
  0x33   :  { %562 = vmatpush.msrb.mxu0 %v3548_v13  ;;  %582 = vmatpush.msrb.mxu1 %v3553_v14 }
  0x34   :  { %525 = vmatpush.msra.mxu2 %v3586_v20  ;;  %545 = vmatpush.msra.mxu3 %v103_v21 }
  0x35   :  { %563 = vmatpush.msrb.mxu0 %v3573_v18  ;;  %583 = vmatpush.msrb.mxu1 %v3579_v19 }
  0x36   :  { %2867 = vmatmul.msk.f32.vlgmr.msra.gmra.mxu2 %vm146_vm0, %v3245_v16  ;;  %2868 = vmatmul.msk.f32.vlgmr.msra.gmra.mxu3 %vm146_vm0, %v3245_v16 }
  0x37   :  { %564 = vmatpush.msrb.mxu0 %v3594_v22  ;;  %584 = vmatpush.msrb.mxu1 %v3600_v23 }
  0x38   :  { %602 = vmatpush.msrb.mxu2 %v3617_v26  ;;  %622 = vmatpush.msrb.mxu3 %v122_v27 }
  0x39   :  { %565 = vmatpush.msrb.mxu0 %v3605_v24  ;;  %585 = vmatpush.msrb.mxu1 %v3610_v25 }
  0x3a   :  { %2869 = vmatmul.msk.f32.vlgmr.msrb.gmra.mxu0 %vm146_vm0, %v3245_v16  ;;  %2870 = vmatmul.msk.f32.vlgmr.msrb.gmra.mxu1 %vm146_vm0, %v3245_v16 }
  0x3b   :  { %603 = vmatpush.msrb.mxu2 %v3631_v28  ;;  %623 = vmatpush.msrb.mxu3 %v121_v29 }
  0x3d   :  { %604 = vmatpush.msrb.mxu2 %v3645_v30  ;;  %624 = vmatpush.msrb.mxu3 %v120_v31 }
  0x3f   :  { %605 = vmatpush.msrb.mxu2 %v3654_v32  ;;  %625 = vmatpush.msrb.mxu3 %v119_v33 }
  0x40   :  { %2871 = vmatmul.msk.f32.vlgmr.msrb.gmra.mxu2 %vm146_vm0, %v3245_v16  ;;  %2872 = vmatmul.msk.f32.vlgmr.msrb.gmra.mxu3 %vm146_vm0, %v3245_v16 }
  0x87   :  { %v167_v35 = vpop.f32.mrf.mxu0 }
  0x88   :  { %v187_v36 = vpop.f32.mrf.mxu1 }
  0x8f   :  { %v207_v37 = vpop.f32.mrf.mxu2  ;;  %v227_v40 = vpop.f32.mrf.mxu3 }
  0x92   :  { %v247_v41 = vpop.f32.mrf.mxu0  ;;  %v267_v44 = vpop.f32.mrf.mxu1 }
  0x99   :  { %v287_v45 = vpop.f32.mrf.mxu2  ;;  %v307_v48 = vpop.f32.mrf.mxu3 }
  0x9c   :  { %v327_v51 = vpop.f32.mrf.mxu0  ;;  %v347_v55 = vpop.f32.mrf.mxu1 }
  0x9d   :  { %2873 = vmatpush.xpose.msk.msra.mxu0 %vm630_vm1, %v327_v51  ;;  %2875 = vmatpush.xpose.msk.msra.mxu1 %vm630_vm1, %v347_v55 }
  0xa0   :  { %2874 = vmatmul.msk.f32.vlgmr.msra.gmra.mxu0 %vm630_vm1, %v167_v35  ;;  %2876 = vmatmul.msk.f32.vlgmr.msra.gmra.mxu1 %vm630_vm1, %v187_v36 }
  0xa3   :  { %v367_v16 = vpop.f32.mrf.mxu2  ;;  %v387_v59 = vpop.f32.mrf.mxu3 }
  0xa4   :  { %2877 = vmatpush.xpose.msk.msra.mxu2 %vm630_vm1, %v367_v16  ;;  %2879 = vmatpush.xpose.msk.msra.mxu3 %vm630_vm1, %v387_v59 }
  0xa5   :  { %v407_v63 = vpop.f32.mrf.mxu0 }
  0xa6   :  { %2881 = vmatpush.xpose.msk.msrb.mxu0 %vm630_vm1, %v407_v63 }
  0xa7   :  { %v427_v10 = vpop.f32.mrf.mxu1  ;;  %2878 = vmatmul.msk.f32.vlgmr.msra.gmra.mxu2 %vm630_vm1, %v207_v37  ;;  %2880 = vmatmul.msk.f32.vlgmr.msra.gmra.mxu3 %vm630_vm1, %v227_v40 }
  0xa8   :  { %2883 = vmatpush.xpose.msk.msrb.mxu1 %vm630_vm1, %v427_v10 }
  0xa9   :  { %2882 = vmatmul.msk.f32.vlgmr.msrb.gmra.mxu0 %vm630_vm1, %v247_v41 }
  0xab   :  { %2884 = vmatmul.msk.f32.vlgmr.msrb.gmra.mxu1 %vm630_vm1, %v267_v44 }
  0xac   :  { %v447_v12 = vpop.f32.mrf.mxu2 }
  0xad   :  { %v467_v17 = vpop.f32.mrf.mxu3  ;;  %2885 = vmatpush.xpose.msk.msrb.mxu2 %vm630_vm1, %v447_v12 }
  0xae   :  { %2887 = vmatpush.xpose.msk.msrb.mxu3 %vm630_vm1, %v467_v17 }
  0xaf   :  { %v487_v21 = vpop.f32.mrf.mxu0  ;;  %v507_v27 = vpop.f32.mrf.mxu1 }
  0xb0   :  { %2886 = vmatmul.msk.f32.vlgmr.msrb.gmra.mxu2 %vm630_vm1, %v287_v45  ;;  %1066 = vmatpush.msra.mxu0 %v487_v21 }
  0xb1   :  { %2888 = vmatmul.msk.f32.vlgmr.msrb.gmra.mxu3 %vm630_vm1, %v307_v48  ;;  %1089 = vmatpush.msra.mxu1 %v507_v27 }
  0xb7   :  { %v567_v29 = vpop.f32.mrf.mxu0  ;;  %v587_v31 = vpop.f32.mrf.mxu1 }
  0xb8   :  { %1158 = vmatpush.msrb.mxu0 %v567_v29  ;;  %1181 = vmatpush.msrb.mxu1 %v587_v31 }
  0xb9   :  { %v527_v33 = vpop.f32.mrf.mxu2  ;;  %v547_v35 = vpop.f32.mrf.mxu3 }
  0xba   :  { %1112 = vmatpush.msra.mxu2 %v527_v33  ;;  %1135 = vmatpush.msra.mxu3 %v547_v35 }
  0xc3   :  { %v607_v36 = vpop.f32.mrf.mxu2  ;;  %v627_v37 = vpop.f32.mrf.mxu3 }
  0xc4   :  { %1204 = vmatpush.msrb.mxu2 %v607_v36  ;;  %1227 = vmatpush.msrb.mxu3 %v627_v37 }
 0x11d   :  { %v654_v40 = vpop.f32.mrf.mxu0  ;;  %v680_v41 = vpop.f32.mrf.mxu1 }
 0x11e   :  { %v839_v44 = vmul.f32 0.25, %v654_v40  ;;  %v840_v45 = vmul.f32 0.25, %v680_v41 }
 0x120   :  { %v851_v48 = vsel %vm847_vm2, %v840_v45, -inf  ;;  %v848_v51 = vsel %vm847_vm2, %v839_v44, -inf }
 0x121   :  { %852 = vmax.xlane.f32.xlu2 %v851_v48  ;;  %849 = vmax.xlane.f32.xlu1 %v848_v51 }
 0x126   :  { %v758_v31 = vpop.f32.mrf.mxu0 }
 0x127   :  { %v843_v37 = vmul.f32 0.25, %v758_v31 }
 0x128   :  { %v784_v35 = vpop.f32.mrf.mxu1 }
 0x129   :  { %v844_v40 = vmul.f32 0.25, %v784_v35  ;;  %v860_v41 = vsel %vm847_vm2, %v843_v37, -inf }
 0x12a   :  { %v706_v55 = vpop.f32.mrf.mxu2  ;;  %v732_v16 = vpop.f32.mrf.mxu3 }
 0x12b   :  { %v841_v59 = vmul.f32 0.25, %v706_v55  ;;  %v842_v10 = vmul.f32 0.25, %v732_v16  ;;  %v863_v48 = vsel %vm847_vm2, %v844_v40, -inf }
 0x12d   :  { %v854_v63 = vsel %vm847_vm2, %v841_v59, -inf  ;;  %v857_v29 = vsel %vm847_vm2, %v842_v10, -inf }
 0x12e   :  { %855 = vmax.xlane.f32.xlu0 %v854_v63 }
 0x133   :  { %v810_v12 = vpop.f32.mrf.mxu2 }
 0x134   :  { %v845_v17 = vmul.f32 0.25, %v810_v12  ;;  %v836_v21 = vpop.f32.mrf.mxu3 }
 0x135   :  { %v846_v27 = vmul.f32 0.25, %v836_v21 }
 0x136   :  { %858 = vmax.xlane.f32.xlu0 %v857_v29  ;;  %v866_v33 = vsel %vm847_vm2, %v845_v17, -inf }
 0x137   :  { %v869_v36 = vsel %vm847_vm2, %v846_v27, -inf  ;;  %867 = vmax.xlane.f32.xlu1 %v866_v33 }
 0x138   :  { %870 = vmax.xlane.f32.xlu2 %v869_v36 }
 0x13e   :  { %861 = vmax.xlane.f32.xlu0 %v860_v41 }
 0x13f   :  { %864 = vmax.xlane.f32.xlu1 %v863_v48 }
 0x194   :  { %v850_v51 = vpop.xlane.xlu1 %849  ;;  %v853_v31 = vpop.xlane.xlu2 %852 }
 0x195   :  { %v872_v55 = vsub.f32 %v839_v44, %v850_v51  ;;  %v873_v44 = vsub.f32 %v840_v45, %v853_v31 }
 0x197   :  { %v880_v16 = vmul.f32 1.442695, %v872_v55 }
 0x199   :  { %2972 = vpow2.f32 %v880_v16 }
 0x19f   :  { %v3688_v63 = vpop.eup %2972 }
 0x1a0   :  { %v896_v21 = vsel %vm847_vm2, %v3688_v63, 0.0 }
 0x1a1   :  { %v856_v12 = vpop.xlane.xlu0 %855  ;;  %897 = vadd.xlane.f32.xlu1 %v896_v21 }
 0x1a2   :  { %v874_v29 = vsub.f32 %v841_v59, %v856_v12  ;;  %v882_v12 = vmul.f32 1.442695, %v873_v44 }
 0x1a4   :  { %v884_v33 = vmul.f32 1.442695, %v874_v29 }
 0x1a6   :  { %2974 = vpow2.f32 %v884_v33 }
 0x1a9   :  { %v859_v35 = vpop.xlane.xlu0 %858 }
 0x1aa   :  { %v875_v36 = vsub.f32 %v842_v10, %v859_v35  ;;  %v868_v24 = vpop.xlane.xlu1 %867 }
 0x1ab   :  { %v871_v41 = vpop.xlane.xlu2 %870  ;;  %v878_v48 = vsub.f32 %v845_v17, %v868_v24 }
 0x1ac   :  { %v3692_v22 = vpop.eup %2974  ;;  %v886_v51 = vmul.f32 1.442695, %v875_v36  ;;  %v879_v55 = vsub.f32 %v846_v27, %v871_v41 }
 0x1ad   :  { %v892_v16 = vmul.f32 1.442695, %v878_v48  ;;  %v902_v18 = vsel %vm847_vm2, %v3692_v22, 0.0 }
 0x1ae   :  { %2976 = vpow2.f32 %v886_v51  ;;  %v894_v59 = vmul.f32 1.442695, %v879_v55  ;;  %903 = vadd.xlane.f32.xlu2 %v902_v18 }
 0x1af   :  { %2978 = vpow2.f32 %v892_v16 }
 0x1b0   :  { %2980 = vpow2.f32 %v894_v59 }
 0x1b1   :  { %v862_v21 = vpop.xlane.xlu0 %861  ;;  %2982 = vpow2.f32 %v882_v12 }
 0x1b2   :  { %v865_v10 = vpop.xlane.xlu1 %864  ;;  %v876_v29 = vsub.f32 %v843_v37, %v862_v21 }
 0x1b3   :  { %v877_v24 = vsub.f32 %v844_v40, %v865_v10 }
 0x1b4   :  { %v3696_v33 = vpop.eup %2976  ;;  %v888_v45 = vmul.f32 1.442695, %v876_v29 }
 0x1b5   :  { %v3698_v17 = vpop.eup %2978  ;;  %v905_v27 = vsel %vm847_vm2, %v3696_v33, 0.0  ;;  %v890_v35 = vmul.f32 1.442695, %v877_v24 }
 0x1b6   :  { %v3702_v31 = vpop.eup %2980  ;;  %2984 = vpow2.f32 %v888_v45  ;;  %v914_v18 = vsel %vm847_vm2, %v3698_v17, 0.0  ;;  %906 = vadd.xlane.f32.xlu0 %v905_v27 }
 0x1b7   :  { %v917_v37 = vsel %vm847_vm2, %v3702_v31, 0.0  ;;  %915 = vadd.xlane.f32.xlu2 %v914_v18  ;;  %v3708_v40 = vpop.eup %2982  ;;  %2986 = vpow2.f32 %v890_v35 }
 0x1b8   :  { %918 = vadd.xlane.f32.xlu1 %v917_v37  ;;  %v899_v41 = vsel %vm847_vm2, %v3708_v40, 0.0 }
 0x1bc   :  { %v3710_v36 = vpop.eup %2984 }
 0x1bd   :  { %v908_v48 = vsel %vm847_vm2, %v3710_v36, 0.0  ;;  %v3716_v44 = vpop.eup %2986 }
 0x1be   :  { %900 = vadd.xlane.f32.xlu0 %v899_v41  ;;  %v911_v51 = vsel %vm847_vm2, %v3716_v44, 0.0 }
 0x1bf   :  { %909 = vadd.xlane.f32.xlu2 %v908_v48 }
 0x1c6   :  { %912 = vadd.xlane.f32.xlu0 %v911_v51 }
 0x214   :  { %v898_v55 = vpop.xlane.xlu1 %897 }
 0x215   :  { %2988 = vrcp.f32 %v898_v55  ;;  %v931_v21 = vand.u32 2147483648, %v898_v55  ;;  %v929_v29 = vand.u32 2147483647, %v898_v55  ;;  %vm925_vm4 = vweird.f32 %v898_v55 }
 0x217   :  { %v932_v27 = vor.u32 1.1754944e-38, %v931_v21  ;;  %vm930_vm6 = vcmp.eq.f32.partialorder %v929_v29, 8.507059e+37 }
 0x21b   :  { %v2989_v16 = vpop.eup %2988 }
 0x21c   :  { %v921_v59 = vmul.f32 %v2989_v16, %v898_v55  ;;  %vm926_vm3 = vweird.f32 %v2989_v16 }
 0x21d   :  { %vm927_vm5 = vmor %vm925_vm4, %vm926_vm3 }
 0x21e   :  { %v922_v12 = vsub.f32 1.0, %v921_v59 }
 0x220   :  { %v923_v10 = vmul.f32 %v2989_v16, %v922_v12 }
 0x221   :  { %v904_v24 = vpop.xlane.xlu2 %903 }
 0x222   :  { %2990 = vrcp.f32 %v904_v24  ;;  %v924_v45 = vadd.f32 %v2989_v16, %v923_v10  ;;  %v959_v55 = vand.u32 2147483647, %v904_v24  ;;  %v961_v21 = vand.u32 2147483648, %v904_v24 }
 0x223   :  { %vm955_vm8 = vweird.f32 %v904_v24 }
 0x224   :  { %v928_v18 = vsel %vm927_vm5, %v2989_v16, %v924_v45  ;;  %vm3733_vm10 = vcmp.eq.f32.partialorder %v959_v55, 8.507059e+37 }
 0x225   :  { %v933_v37 = vsel %vm930_vm6, %v932_v27, %v928_v18 }
 0x226   :  { %v934_v35 = vmul.f32 %v3688_v63, %v933_v37  ;;  %v124_v63 = vld [vmem:[%s4364_s2 + $0x8] sm:$0xff]  ;;  %v962_v37 = vor.u32 1.1754944e-38, %v961_v21 }
 0x228   :  { %v2991_v41 = vpop.eup %2990  ;;  %1040 = vst.msk [vmem:[#allocation4] sm:$0xff] %vm847_vm2, %v934_v35  ;;  %2889 = vmatmul.msk.f32.vlgmr.msra.gmra.mxu0 %vm847_vm2, %v934_v35 }
 0x229   :  { %v951_v48 = vmul.f32 %v2991_v41, %v904_v24  ;;  %v907_v51 = vpop.xlane.xlu0 %906  ;;  %vm956_vm7 = vweird.f32 %v2991_v41  ;;  %1249 = vmatpush.msra.mxu0 %v124_v63 }
 0x22a   :  { %v916_v59 = vpop.xlane.xlu2 %915  ;;  %2992 = vrcp.f32 %v907_v51  ;;  %vm3729_vm9 = vmor %vm955_vm8, %vm956_vm7  ;;  %vm970_vm11 = vweird.f32 %v907_v51  ;;  %v974_v32 = vand.u32 2147483647, %v907_v51 }
 0x22b   :  { %v952_v12 = vsub.f32 1.0, %v951_v48  ;;  %2994 = vrcp.f32 %v916_v59  ;;  %v3723_v10 = vpop.xlane.xlu1 %918  ;;  %vm1015_vm12 = vweird.f32 %v916_v59  ;;  %v1019_v30 = vand.u32 2147483647, %v916_v59 }
 0x22c   :  { %2996 = vrcp.f32 %v3723_v10  ;;  %v1021_v55 = vand.u32 2147483648, %v916_v59  ;;  %vm1030_vm13 = vweird.f32 %v3723_v10  ;;  %v1034_v27 = vand.u32 2147483647, %v3723_v10 }
 0x22d   :  { %v953_v16 = vmul.f32 %v2991_v41, %v952_v12  ;;  %v1036_v5 = vand.u32 2147483648, %v3723_v10  ;;  %vm3751_vm3 = vcmp.eq.f32.partialorder %v1019_v30, 8.507059e+37  ;;  %vm3755_vm4 = vcmp.eq.f32.partialorder %v974_v32, 8.507059e+37 }
 0x22e   :  { %v1022_v20 = vor.u32 1.1754944e-38, %v1021_v55  ;;  %vm3760_vm6 = vcmp.eq.f32.partialorder %v1034_v27, 8.507059e+37 }
 0x22f   :  { %v954_v29 = vadd.f32 %v2991_v41, %v953_v16  ;;  %v976_v16 = vand.u32 2147483648, %v907_v51  ;;  %v1037_v19 = vor.u32 1.1754944e-38, %v1036_v5 }
 0x230   :  { %v2993_v45 = vpop.eup %2992 }
 0x231   :  { %v2995_v35 = vpop.eup %2994  ;;  %v958_v48 = vsel %vm3729_vm9, %v2991_v41, %v954_v29  ;;  %v966_v12 = vmul.f32 %v2993_v45, %v907_v51  ;;  %v3739_v24 = vpop.xlane.xlu0 %900  ;;  %vm971_vm14 = vweird.f32 %v2993_v45  ;;  %v977_v30 = vor.u32 1.1754944e-38, %v976_v16 }
 0x232   :  { %v2997_v63 = vpop.eup %2996  ;;  %v1011_v13 = vmul.f32 %v2995_v35, %v916_v59  ;;  %v3741_v7 = vpop.xlane.xlu2 %909  ;;  %2998 = vrcp.f32 %v3739_v24  ;;  %v963_v41 = vsel %vm3733_vm10, %v962_v37, %v958_v48  ;;  %vm1016_vm15 = vweird.f32 %v2995_v35  ;;  %vm972_vm7 = vmor %vm970_vm11, %vm971_vm14 }
 0x233   :  { %v1026_v21 = vmul.f32 %v2997_v63, %v3723_v10  ;;  %v967_v28 = vsub.f32 1.0, %v966_v12  ;;  %3000 = vrcp.f32 %v3741_v7  ;;  %vm1031_vm5 = vweird.f32 %v2997_v63  ;;  %vm1017_vm8 = vmor %vm1015_vm12, %vm1016_vm15 }
 0x234   :  { %v1012_v29 = vsub.f32 1.0, %v1011_v13  ;;  %v964_v37 = vmul.f32 %v3692_v22, %v963_v41  ;;  %vm1032_vm9 = vmor %vm1030_vm13, %vm1031_vm5  ;;  %v991_v5 = vand.u32 2147483648, %v3741_v7  ;;  %v944_v10 = vand.u32 2147483647, %v3739_v24 }
 0x235   :  { %v1027_v25 = vsub.f32 1.0, %v1026_v21  ;;  %v968_v26 = vmul.f32 %v2993_v45, %v967_v28  ;;  %v946_v27 = vand.u32 2147483648, %v3739_v24  ;;  %v989_v3 = vand.u32 2147483647, %v3741_v7 }
 0x236   :  { %v1013_v23 = vmul.f32 %v2995_v35, %v1012_v29  ;;  %1042 = vst.msk [vmem:[#allocation4 + $0x10] sm:$0xff] %vm847_vm2, %v964_v37  ;;  %2891 = vmatmul.msk.f32.vlgmr.msra.gmra.mxu2 %vm847_vm2, %v964_v37  ;;  %vm940_vm12 = vweird.f32 %v3739_v24  ;;  %vm985_vm13 = vweird.f32 %v3741_v7 }
 0x237   :  { %v1028_v13 = vmul.f32 %v2997_v63, %v1027_v25  ;;  %v969_v18 = vadd.f32 %v2993_v45, %v968_v26 }
 0x238   :  { %v2999_v48 = vpop.eup %2998  ;;  %v1014_v21 = vadd.f32 %v2995_v35, %v1013_v23 }
 0x239   :  { %v3001_v29 = vpop.eup %3000  ;;  %v1029_v32 = vadd.f32 %v2997_v63, %v1028_v13  ;;  %v973_v25 = vsel %vm972_vm7, %v2993_v45, %v969_v18  ;;  %v936_v26 = vmul.f32 %v2999_v48, %v3739_v24  ;;  %v913_v22 = vpop.xlane.xlu0 %912  ;;  %vm941_vm10 = vweird.f32 %v2999_v48 }
 0x23a   :  { %v1018_v23 = vsel %vm1017_vm8, %v2995_v35, %v1014_v21  ;;  %v978_v51 = vsel %vm3755_vm4, %v977_v30, %v973_v25  ;;  %v981_v59 = vmul.f32 %v3001_v29, %v3741_v7  ;;  %3002 = vrcp.f32 %v913_v22  ;;  %vm942_vm14 = vmor %vm940_vm12, %vm941_vm10 }
 0x23b   :  { %v1023_v45 = vsel %vm3751_vm3, %v1022_v20, %v1018_v23  ;;  %v1033_v16 = vsel %vm1032_vm9, %v2997_v63, %v1029_v32  ;;  %v937_v55 = vsub.f32 1.0, %v936_v26  ;;  %v979_v13 = vmul.f32 %v3696_v33, %v978_v51 }
 0x23c   :  { %v1038_v35 = vsel %vm3760_vm6, %v1037_v19, %v1033_v16  ;;  %v982_v41 = vsub.f32 1.0, %v981_v59  ;;  %v1024_v18 = vmul.f32 %v3698_v17, %v1023_v45  ;;  %vm986_vm11 = vweird.f32 %v3001_v29  ;;  %v3806_v45 = vld [vmem:[%s4364_s2] sm:$0xff]  ;;  %v3824_v16 = vld [vmem:[%s4364_s2 + $0x38] sm:$0xff] }
 0x23d   :  { %v938_v12 = vmul.f32 %v2999_v48, %v937_v55  ;;  %v1039_v20 = vmul.f32 %v3702_v31, %v1038_v35  ;;  %1043 = vst.msk [vmem:[#allocation4 + $0x18] sm:$0xff] %vm847_vm2, %v979_v13  ;;  %2892 = vmatmul.msk.f32.vlgmr.msra.gmra.mxu3 %vm847_vm2, %v979_v13  ;;  %v947_v33 = vor.u32 1.1754944e-38, %v946_v27  ;;  %vm987_vm15 = vmor %vm985_vm13, %vm986_vm11  ;;  %v992_v21 = vor.u32 1.1754944e-38, %v991_v5  ;;  %1250 = vmatpush.msra.mxu0 %v3806_v45  ;;  %v3829_v55 = vld [vmem:[%s4364_s2 + $0x68] sm:$0xff]  ;;  %v3836_v35 = vld [vmem:[%s4364_s2 + $0x18] sm:$0xff] }
 0x23e   :  { %v983_v37 = vmul.f32 %v3001_v29, %v982_v41  ;;  %1046 = vst.msk [vmem:[#allocation4 + $0x30] sm:$0xff] %vm847_vm2, %v1024_v18  ;;  %vm945_vm3 = vcmp.eq.f32.partialorder %v944_v10, 8.507059e+37  ;;  %2895 = vmatmul.msk.f32.vlgmr.msrb.gmra.mxu2 %vm847_vm2, %v1024_v18  ;;  %vm990_vm4 = vcmp.eq.f32.partialorder %v989_v3, 8.507059e+37  ;;  %v1006_v23 = vand.u32 2147483648, %v913_v22  ;;  %1318 = vmatpush.msra.mxu3 %v3824_v16  ;;  %v3841_v41 = vld [vmem:[%s4364_s2 + $0x30] sm:$0xff]  ;;  %v3846_v10 = vld [vmem:[%s4364_s2 + $0x48] sm:$0xff] }
 0x23f   :  { %v939_v63 = vadd.f32 %v2999_v48, %v938_v12  ;;  %1047 = vst.msk [vmem:[#allocation4 + $0x38] sm:$0xff] %vm847_vm2, %v1039_v20  ;;  %v1004_v51 = vand.u32 2147483647, %v913_v22  ;;  %vm1000_vm6 = vweird.f32 %v913_v22  ;;  %v3853_v27 = vld [vmem:[%s4364_s2 + $0x60] sm:$0xff]  ;;  %v3860_v12 = vld [vmem:[%s4364_s2 + $0x10] sm:$0xff]  ;;  %v3870_v18 = vld [vmem:[%s4364_s2 + $0x78] sm:$0xff] }
 0x240   :  { %v984_v19 = vadd.f32 %v3001_v29, %v983_v37  ;;  %v3003_v17 = vpop.eup %3002  ;;  %1319 = vmatpush.msra.mxu3 %v3841_v41  ;;  %v3865_v13 = vld [vmem:[%s4364_s2 + $0x40] sm:$0xff]  ;;  %v3879_v3 = vld [vmem:[%s4364_s2 + $0x58] sm:$0xff] }
 0x241   :  { %v943_v28 = vsel %vm942_vm14, %v2999_v48, %v939_v63  ;;  %v996_v30 = vmul.f32 %v3003_v17, %v913_v22  ;;  %vm1001_vm5 = vweird.f32 %v3003_v17  ;;  %vm1005_vm8 = vcmp.eq.f32.partialorder %v1004_v51, 8.507059e+37  ;;  %v3812_v22 = vld [vmem:[%s4364_s2 + $0x28] sm:$0xff]  ;;  %v3891_v63 = vld [vmem:[%s4364_s2 + $0x50] sm:$0xff] }
 0x242   :  { %v988_v31 = vsel %vm987_vm15, %v3001_v29, %v984_v19  ;;  %v948_v24 = vsel %vm945_vm3, %v947_v33, %v943_v28  ;;  %vm1002_vm7 = vmor %vm1000_vm6, %vm1001_vm5  ;;  %1295 = vmatpush.msra.mxu2 %v3812_v22  ;;  %v3044_v33 = vld [vmem:[%s4363_s1 + $0x38] sm:$0xff]  ;;  %v3053_v51 = vld [vmem:[%s4363_s1 + $0x10] sm:$0xff] }
 0x243   :  { %v993_v32 = vsel %vm990_vm4, %v992_v21, %v988_v31  ;;  %v949_v7 = vmul.f32 %v3708_v40, %v948_v24  ;;  %v997_v25 = vsub.f32 1.0, %v996_v30  ;;  %v1007_v40 = vor.u32 1.1754944e-38, %v1006_v23  ;;  %v3046_v31 = vld [vmem:[%s4363_s1 + $0x28] sm:$0xff]  ;;  %v3051_v23 = vld [vmem:[%s4363_s1 + $0x50] sm:$0xff] }
 0x244   :  { %v994_v26 = vmul.f32 %v3710_v36, %v993_v32  ;;  %v3047_v32 = vld [vmem:[%s4363_s1 + $0x20] sm:$0xff] }
 0x245   :  { %1041 = vst.msk [vmem:[#allocation4 + $0x8] sm:$0xff] %vm847_vm2, %v949_v7  ;;  %2890 = vmatmul.msk.f32.vlgmr.msra.gmra.mxu1 %vm847_vm2, %v949_v7  ;;  %v998_v48 = vmul.f32 %v3003_v17, %v997_v25  ;;  %2896 = vmatmul.msk.f32.vlgmr.msrb.gmra.mxu3 %vm847_vm2, %v1039_v20  ;;  %v3884_v20 = vld [vmem:[%s4364_s2 + $0x70] sm:$0xff]  ;;  %v3048_v7 = vld [vmem:[%s4363_s1 + $0x58] sm:$0xff] }
 0x246   :  { %1044 = vst.msk [vmem:[#allocation4 + $0x20] sm:$0xff] %vm847_vm2, %v994_v26  ;;  %2893 = vmatmul.msk.f32.vlgmr.msrb.gmra.mxu0 %vm847_vm2, %v994_v26  ;;  %1272 = vmatpush.msra.mxu1 %v3836_v35  ;;  %v3049_v25 = vld [vmem:[%s4363_s1 + $0xb8] sm:$0xff] }
 0x247   :  { %v999_v29 = vadd.f32 %v3003_v17, %v998_v48  ;;  %1341 = vmatpush.msrb.mxu0 %v3846_v10  ;;  %1410 = vmatpush.msrb.mxu3 %v3870_v18  ;;  %v3050_v26 = vld [vmem:[%s4363_s1 + $0x18] sm:$0xff]  ;;  %v3052_v48 = vld [vmem:[%s4363_s1 + $0xb0] sm:$0xff] }
 0x248   :  { %1273 = vmatpush.msra.mxu1 %v3860_v12 }
 0x249   :  { %v1003_v59 = vsel %vm1002_vm7, %v3003_v17, %v999_v29  ;;  %1342 = vmatpush.msrb.mxu0 %v3865_v13  ;;  %1411 = vmatpush.msrb.mxu3 %v3884_v20  ;;  %v3045_v17 = vld [vmem:[%s4363_s1 + $0x30] sm:$0xff]  ;;  %v3054_v29 = vld [vmem:[%s4363_s1 + $0x48] sm:$0xff] }
 0x24a   :  { %v1008_v36 = vsel %vm1005_vm8, %v1007_v40, %v1003_v59  ;;  %v3935_v59 = vld [vmem:[%s4362_s0 + $0x8] sm:$0xff] }
 0x24b   :  { %v1009_v5 = vmul.f32 %v3716_v44, %v1008_v36  ;;  %v3818_v44 = vld [vmem:[%s4364_s2 + $0x20] sm:$0xff]  ;;  %v3055_v36 = vld [vmem:[%s4363_s1 + $0xa8] sm:$0xff] }
 0x24c   :  { %1296 = vmatpush.msra.mxu2 %v3818_v44 }
 0x24d   :  { %1045 = vst.msk [vmem:[#allocation4 + $0x28] sm:$0xff] %vm847_vm2, %v1009_v5  ;;  %2894 = vmatmul.msk.f32.vlgmr.msrb.gmra.mxu1 %vm847_vm2, %v1009_v5  ;;  %v3056_v5 = vld [vmem:[%s4363_s1 + $0x8] sm:$0xff] }
 0x24e   :  { %1387 = vmatpush.msrb.mxu2 %v3829_v55  ;;  %1364 = vmatpush.msrb.mxu1 %v3879_v3 }
 0x250   :  { %1388 = vmatpush.msrb.mxu2 %v3853_v27  ;;  %1365 = vmatpush.msrb.mxu1 %v3891_v63 }
 0x2a5   :  { %v1068_v37 = vpop.f32.mrf.mxu0 }
 0x2a6   :  { %2897 = vmatmul.msk.f32.vlgmr.msra.gmra.mxu0 %vm630_vm1, %v1068_v37 }
 0x2b9   :  { %v1114_v19 = vpop.f32.mrf.mxu2 }
 0x2ba   :  { %2899 = vmatmul.msk.f32.vlgmr.msra.gmra.mxu2 %vm630_vm1, %v1114_v19  ;;  %v3057_v19 = vld [vmem:[%s4363_s1 + $0x40] sm:$0xff] }
 0x2bb   :  { %1519 = vmatpush.msra.mxu2 %v3044_v33  ;;  %v3058_v33 = vld [vmem:[%s4363_s1 + $0xd8] sm:$0xff] }
 0x2bd   :  { %1520 = vmatpush.msra.mxu2 %v3045_v17  ;;  %v3059_v17 = vld [vmem:[%s4363_s1 + $0xa0] sm:$0xff] }
 0x2bf   :  { %1521 = vmatpush.msra.mxu2 %v3046_v31  ;;  %v3062_v31 = vld [vmem:[%s4363_s1 + $0x98] sm:$0xff] }
 0x2c0   :  { %v1137_v21 = vpop.f32.mrf.mxu3 }
 0x2c1   :  { %2900 = vmatmul.msk.f32.vlgmr.msra.gmra.mxu3 %vm630_vm1, %v1137_v21  ;;  %v1206_v30 = vpop.f32.mrf.mxu2  ;;  %1522 = vmatpush.msra.mxu2 %v3047_v32  ;;  %v3060_v21 = vld [vmem:[%s4363_s1] sm:$0xff] }
 0x2c2   :  { %v1091_v28 = vpop.f32.mrf.mxu1  ;;  %2903 = vmatmul.msk.f32.vlgmr.msrb.gmra.mxu2 %vm630_vm1, %v1206_v30  ;;  %1539 = vmatpush.msra.mxu3 %v3048_v7  ;;  %v3065_v30 = vld [vmem:[%s4363_s1 + $0xc0] sm:$0xff]  ;;  %v3075_v7 = vld [vmem:[%s4363_s1 + $0x68] sm:$0xff] }
 0x2c3   :  { %v1160_v24 = vpop.f32.mrf.mxu0  ;;  %2898 = vmatmul.msk.f32.vlgmr.msra.gmra.mxu1 %vm630_vm1, %v1091_v28  ;;  %1599 = vmatpush.msrb.mxu2 %v3049_v25  ;;  %v3061_v28 = vld [vmem:[%s4363_s1 + $0xd0] sm:$0xff]  ;;  %v3068_v32 = vld [vmem:[%s4363_s1 + $0x80] sm:$0xff] }
 0x2c4   :  { %2901 = vmatmul.msk.f32.vlgmr.msrb.gmra.mxu0 %vm630_vm1, %v1160_v24  ;;  %1499 = vmatpush.msra.mxu1 %v3050_v26  ;;  %v3063_v24 = vld [vmem:[%s4363_s1 + $0xc8] sm:$0xff]  ;;  %v3076_v25 = vld [vmem:[%s4363_s1 + $0x60] sm:$0xff] }
 0x2c5   :  { %1540 = vmatpush.msra.mxu3 %v3051_v23  ;;  %1600 = vmatpush.msrb.mxu2 %v3052_v48 }
 0x2c6   :  { %1500 = vmatpush.msra.mxu1 %v3053_v51 }
 0x2c7   :  { %1541 = vmatpush.msra.mxu3 %v3054_v29  ;;  %1601 = vmatpush.msrb.mxu2 %v3055_v36 }
 0x2c8   :  { %v1229_v40 = vpop.f32.mrf.mxu3  ;;  %1501 = vmatpush.msra.mxu1 %v3056_v5 }
 0x2c9   :  { %2904 = vmatmul.msk.f32.vlgmr.msrb.gmra.mxu3 %vm630_vm1, %v1229_v40  ;;  %1602 = vmatpush.msrb.mxu2 %v3059_v17 }
 0x2ca   :  { %v1183_v37 = vpop.f32.mrf.mxu1  ;;  %1542 = vmatpush.msra.mxu3 %v3057_v19  ;;  %2909 = vmatmul.msk.f32.vlgmr.msra.gmra.mxu2 %vm146_vm0, %v3935_v59 }
 0x2cb   :  { %2902 = vmatmul.msk.f32.vlgmr.msrb.gmra.mxu1 %vm630_vm1, %v1183_v37  ;;  %1679 = vmatpush.msra.mxu2 %v3309_v34  ;;  %v3064_v34 = vld [vmem:[%s4363_s1 + $0x90] sm:$0xff] }
 0x2cc   :  { %1619 = vmatpush.msrb.mxu3 %v3058_v33  ;;  %1502 = vmatpush.msra.mxu1 %v3060_v21 }
 0x2cd   :  { %1680 = vmatpush.msra.mxu2 %v3331_v38  ;;  %v3066_v38 = vld [vmem:[%s4363_s1 + $0x158] sm:$0xff] }
 0x2ce   :  { %1620 = vmatpush.msrb.mxu3 %v3061_v28  ;;  %1579 = vmatpush.msrb.mxu1 %v3062_v31 }
 0x2cf   :  { %1681 = vmatpush.msra.mxu2 %v3348_v42  ;;  %v3067_v42 = vld [vmem:[%s4363_s1 + $0x88] sm:$0xff] }
 0x2d0   :  { %1621 = vmatpush.msrb.mxu3 %v3063_v24  ;;  %1580 = vmatpush.msrb.mxu1 %v3064_v34 }
 0x2d1   :  { %2910 = vmatmul.msk.f32.vlgmr.msra.gmra.mxu3 %vm146_vm0, %v3935_v59  ;;  %1682 = vmatpush.msra.mxu2 %v3366_v46  ;;  %v3069_v46 = vld [vmem:[%s4363_s1 + $0x118] sm:$0xff] }
 0x2d2   :  { %1622 = vmatpush.msrb.mxu3 %v3065_v30  ;;  %2913 = vmatmul.msk.f32.vlgmr.msrb.gmra.mxu2 %vm146_vm0, %v3935_v59 }
 0x2d3   :  { %2908 = vmatmul.msk.f32.vlgmr.msra.gmra.mxu1 %vm146_vm0, %v3935_v59  ;;  %1759 = vmatpush.msrb.mxu2 %v3400_v52  ;;  %v4412_v52 = vld [vmem:[#allocation8_spill] sm:$0xff] }
 0x2d4   :  { %1699 = vmatpush.msra.mxu3 %v3066_v38  ;;  %1581 = vmatpush.msrb.mxu1 %v3067_v42 }
 0x2d5   :  { %1760 = vmatpush.msrb.mxu2 %v3424_v56  ;;  %v4415_v56 = vld [vmem:[#allocation9_spill] sm:$0xff] }
 0x2d6   :  { %1700 = vmatpush.msra.mxu3 %v3337_v39  ;;  %1582 = vmatpush.msrb.mxu1 %v3068_v32  ;;  %v3070_v39 = vld [vmem:[%s4363_s1 + $0x110] sm:$0xff] }
 0x2d7   :  { %1761 = vmatpush.msrb.mxu2 %v3445_v60  ;;  %v4418_v60 = vld [vmem:[#allocation10_spill] sm:$0xff] }
 0x2d8   :  { %1701 = vmatpush.msra.mxu3 %v3353_v43  ;;  %1659 = vmatpush.msra.mxu1 %v3069_v46  ;;  %v3071_v43 = vld [vmem:[%s4363_s1 + $0x108] sm:$0xff]  ;;  %v4118_v46 = vld [vmem:[%s4365_s3] ss:$0 sm:$0xff] }
 0x2d9   :  { %2914 = vmatmul.msk.f32.vlgmr.msrb.gmra.mxu3 %vm146_vm0, %v3935_v59  ;;  %1762 = vmatpush.msrb.mxu2 %v3467_v0  ;;  %v4421_v0 = vld [vmem:[#allocation22_spill] sm:$0xff] }
 0x2da   :  { %1702 = vmatpush.msra.mxu3 %v3372_v47  ;;  %2917 = vmatmul.msk.f32.vlgmr.msra.gmra.mxu2 %vm146_vm0, %v3935_v59  ;;  %v3072_v47 = vld [vmem:[%s4363_s1 + $0x100] sm:$0xff] }
 0x2db   :  { %2912 = vmatmul.msk.f32.vlgmr.msrb.gmra.mxu1 %vm146_vm0, %v3935_v59  ;;  %1839 = vmatpush.msra.mxu2 %v3481_v2  ;;  %v4423_v2 = vld [vmem:[#allocation15_spill] sm:$0xff] }
 0x2dc   :  { %1779 = vmatpush.msrb.mxu3 %v3388_v50  ;;  %1660 = vmatpush.msra.mxu1 %v3070_v39  ;;  %v4411_v50 = vld [vmem:[#allocation14_spill] sm:$0xff] }
 0x2dd   :  { %1840 = vmatpush.msra.mxu2 %v3498_v4  ;;  %v4424_v4 = vld [vmem:[#allocation17_spill] sm:$0xff] }
 0x2de   :  { %1780 = vmatpush.msrb.mxu3 %v3414_v54  ;;  %1661 = vmatpush.msra.mxu1 %v3071_v43  ;;  %v4414_v54 = vld [vmem:[#allocation19_spill] sm:$0xff] }
 0x2df   :  { %1841 = vmatpush.msra.mxu2 %v3512_v6  ;;  %v4075_v6 = vld [vmem:[%s4366_s4 + $0x18] sm:$0xff] }
 0x2e0   :  { %1781 = vmatpush.msrb.mxu3 %v3435_v58  ;;  %1662 = vmatpush.msra.mxu1 %v3072_v47  ;;  %v4417_v58 = vld [vmem:[#allocation20_spill] sm:$0xff] }
 0x2e1   :  { %2918 = vmatmul.msk.f32.vlgmr.msra.gmra.mxu3 %vm146_vm0, %v3935_v59  ;;  %1842 = vmatpush.msra.mxu2 %v3524_v8  ;;  %v4081_v8 = vld [vmem:[%s4366_s4 + $0x10] sm:$0xff] }
 0x2e2   :  { %1739 = vmatpush.msrb.mxu1 %v3383_v49  ;;  %1782 = vmatpush.msrb.mxu3 %v3456_v62  ;;  %v4410_v49 = vld [vmem:[#allocation13_spill] sm:$0xff]  ;;  %v4420_v62 = vld [vmem:[#allocation11_spill] sm:$0xff] }
 0x2e3   :  { %2916 = vmatmul.msk.f32.vlgmr.msra.gmra.mxu1 %vm146_vm0, %v3935_v59  ;;  %2921 = vmatmul.msk.f32.vlgmr.msrb.gmra.mxu2 %vm146_vm0, %v3935_v59 }
 0x2e4   :  { %1740 = vmatpush.msrb.mxu1 %v3409_v53  ;;  %1859 = vmatpush.msra.mxu3 %v3529_v9  ;;  %v4413_v53 = vld [vmem:[#allocation16_spill] sm:$0xff]  ;;  %v4087_v9 = vld [vmem:[%s4366_s4 + $0x8] sm:$0xff] }
 0x2e5   :  { %1919 = vmatpush.msrb.mxu2 %v3553_v14  ;;  %1453 = vmatpush.msra.mxu0 %v4075_v6  ;;  %v3073_v14 = vld [vmem:[%s4363_s1 + $0x78] sm:$0xff] }
 0x2e6   :  { %1741 = vmatpush.msrb.mxu1 %v3430_v57  ;;  %1860 = vmatpush.msra.mxu3 %v3538_v11  ;;  %v4416_v57 = vld [vmem:[#allocation18_spill] sm:$0xff] }
 0x2e7   :  { %1920 = vmatpush.msrb.mxu2 %v4410_v49  ;;  %1454 = vmatpush.msra.mxu0 %v4081_v8  ;;  %v4092_v11 = vld [vmem:[%s4366_s4] sm:$0xff]  ;;  %s2817_s4 = sshll.u32 %s3153_s7, 4  ;;  %s2818_s4 = int_to_ptr.vmem [resolvable:$true] %s2817_s4 }
 0x2e8   :  { %1742 = vmatpush.msrb.mxu1 %v3451_v61  ;;  %1861 = vmatpush.msra.mxu3 %v3565_v15  ;;  %v4419_v61 = vld [vmem:[#allocation21_spill] sm:$0xff]  ;;  %v3074_v15 = vld [vmem:[%s4363_s1 + $0x70] sm:$0xff] }
 0x2e9   :  { %2922 = vmatmul.msk.f32.vlgmr.msrb.gmra.mxu3 %vm146_vm0, %v3935_v59  ;;  %1921 = vmatpush.msrb.mxu2 %v4413_v53 }
 0x2ea   :  { %1819 = vmatpush.msra.mxu1 %v3476_v1  ;;  %1862 = vmatpush.msra.mxu3 %v4411_v50  ;;  %v4422_v1 = vld [vmem:[#allocation12_spill] sm:$0xff] }
 0x2eb   :  { %2920 = vmatmul.msk.f32.vlgmr.msrb.gmra.mxu1 %vm146_vm0, %v3935_v59  ;;  %2925 = vmatmul.msk.f32.vlgmr.msra.gmra.mxu2 %vm146_vm0, %v3935_v59 }
 0x2ec   :  { %1820 = vmatpush.msra.mxu1 %v4412_v52  ;;  %1939 = vmatpush.msrb.mxu3 %v4414_v54  ;;  %v3077_v52 = vld [vmem:[%s4363_s1 + $0xf8] sm:$0xff]  ;;  %v3078_v54 = vld [vmem:[%s4363_s1 + $0xf0] sm:$0xff] }
 0x2ed   :  { %1922 = vmatpush.msrb.mxu2 %v4416_v57  ;;  %1455 = vmatpush.msra.mxu0 %v4087_v9  ;;  %v3079_v57 = vld [vmem:[%s4363_s1 + $0xe8] sm:$0xff] }
 0x2ee   :  { %1821 = vmatpush.msra.mxu1 %v4415_v56  ;;  %1940 = vmatpush.msrb.mxu3 %v4417_v58 }
 0x2ef   :  { %1456 = vmatpush.msra.mxu0 %v4092_v11 }
 0x2f0   :  { %1822 = vmatpush.msra.mxu1 %v4418_v60  ;;  %1941 = vmatpush.msrb.mxu3 %v4419_v61  ;;  %v3080_v60 = vld [vmem:[%s4363_s1 + $0xe0] sm:$0xff]  ;;  %v3081_v61 = vld [vmem:[%s4363_s1 + $0x178] sm:$0xff] }
 0x2f1   :  { %2926 = vmatmul.msk.f32.vlgmr.msra.gmra.mxu3 %vm146_vm0, %v3935_v59  ;;  %1559 = vmatpush.msrb.mxu0 %v3073_v14  ;;  %v3084_v14 = vld [vmem:[%s4363_s1 + $0x160] sm:$0xff] }
 0x2f2   :  { %1899 = vmatpush.msrb.mxu1 %v4420_v62  ;;  %1942 = vmatpush.msrb.mxu3 %v4421_v0  ;;  %v3082_v0 = vld [vmem:[%s4363_s1 + $0x170] sm:$0xff] }
 0x2f3   :  { %2924 = vmatmul.msk.f32.vlgmr.msra.gmra.mxu1 %vm146_vm0, %v3935_v59  ;;  %2929 = vmatmul.msk.f32.vlgmr.msrb.gmra.mxu2 %vm146_vm0, %v3935_v59 }
 0x2f4   :  { %1900 = vmatpush.msrb.mxu1 %v4422_v1  ;;  %1560 = vmatpush.msrb.mxu0 %v3074_v15  ;;  %v3085_v15 = vld [vmem:[%s4363_s1 + $0x1f8] sm:$0xff] }
 0x2f6   :  { %1901 = vmatpush.msrb.mxu1 %v4423_v2  ;;  %1561 = vmatpush.msrb.mxu0 %v3075_v7  ;;  %v3083_v2 = vld [vmem:[%s4363_s1 + $0x168] sm:$0xff] }
 0x2f8   :  { %1902 = vmatpush.msrb.mxu1 %v4424_v4  ;;  %1562 = vmatpush.msrb.mxu0 %v3076_v25  ;;  %v3086_v25 = vld [vmem:[%s4363_s1 + $0x1f0] sm:$0xff] }
 0x2f9   :  { %2930 = vmatmul.msk.f32.vlgmr.msrb.gmra.mxu3 %vm146_vm0, %v3935_v59 }
 0x2fb   :  { %2928 = vmatmul.msk.f32.vlgmr.msrb.gmra.mxu1 %vm146_vm0, %v3935_v59 }
 0x323   :  { %v1252_v26 = vpop.f32.mrf.mxu0 }
 0x324   :  { %v1416_v51 = vsel %vm146_vm0, %v1252_v26, 0.0 }
 0x33d   :  { %v1298_v23 = vpop.f32.mrf.mxu2 }
 0x33e   :  { %v1419_v36 = vsel %vm146_vm0, %v1298_v23, 0.0  ;;  %v3087_v23 = vld [vmem:[%s4363_s1 + $0x1e8] sm:$0xff] }
 0x340   :  { %v1275_v48 = vpop.f32.mrf.mxu1 }
 0x341   :  { %v1417_v29 = vsel %vm146_vm0, %v1275_v48, 0.0  ;;  %v1344_v37 = vpop.f32.mrf.mxu0 }
 0x342   :  { %v1418_v40 = vadd.f32 %v1417_v29, %v1416_v51  ;;  %v1423_v28 = vsel %vm146_vm0, %v1344_v37, 0.0  ;;  %v3088_v51 = vld [vmem:[%s4363_s1 + $0x1e0] sm:$0xff]  ;;  %v3089_v29 = vld [vmem:[%s4363_s1 + $0x278] sm:$0xff] }
 0x343   :  { %v3092_v37 = vld [vmem:[%s4363_s1 + $0x260] sm:$0xff] }
 0x344   :  { %v1420_v5 = vadd.f32 %v1419_v36, %v1418_v40  ;;  %v1321_v19 = vpop.f32.mrf.mxu3  ;;  %v3090_v36 = vld [vmem:[%s4363_s1 + $0x270] sm:$0xff] }
 0x345   :  { %v1421_v33 = vsel %vm146_vm0, %v1321_v19, 0.0  ;;  %v1390_v21 = vpop.f32.mrf.mxu2  ;;  %v3093_v19 = vld [vmem:[%s4363_s1 + $0x2f8] sm:$0xff] }
 0x346   :  { %v1422_v17 = vadd.f32 %v1421_v33, %v1420_v5  ;;  %v1427_v38 = vsel %vm146_vm0, %v1390_v21, 0.0  ;;  %v3091_v5 = vld [vmem:[%s4363_s1 + $0x268] sm:$0xff]  ;;  %v3094_v33 = vld [vmem:[%s4363_s1 + $0x2f0] sm:$0xff]  ;;  %v3096_v21 = vld [vmem:[%s4363_s1 + $0x2e0] sm:$0xff] }
 0x348   :  { %v1367_v31 = vpop.f32.mrf.mxu1  ;;  %v1424_v24 = vadd.f32 %v1423_v28, %v1422_v17  ;;  %v3095_v17 = vld [vmem:[%s4363_s1 + $0x2e8] sm:$0xff] }
 0x349   :  { %v1425_v34 = vsel %vm146_vm0, %v1367_v31, 0.0 }
 0x34a   :  { %v1426_v30 = vadd.f32 %v1425_v34, %v1424_v24 }
 0x34c   :  { %v1413_v42 = vpop.f32.mrf.mxu3  ;;  %v1428_v32 = vadd.f32 %v1427_v38, %v1426_v30 }
 0x34d   :  { %v1429_v39 = vsel %vm146_vm0, %v1413_v42, 0.0  ;;  %v1524_v47 = vpop.f32.mrf.mxu2  ;;  %v4213_v42 = vld [vmem:[%s4367_s5] ss:$0 sm:$0xff] }
 0x34e   :  { %v1430_v43 = vadd.f32 %v1429_v39, %v1428_v32 }
 0x350   :  { %v1504_v49 = vpop.f32.mrf.mxu1  ;;  %v4122_v50 = vadd.f32 %v4118_v46, %v1430_v43 }
 0x352   :  { %2905 = vmatmul.msk.f32.vlgmr.msra.gmra.mxu0 %vm146_vm0, %v4122_v50 }
 0x353   :  { %1639 = vmatpush.msra.mxu0 %v3077_v52 }
 0x354   :  { %v1544_v53 = vpop.f32.mrf.mxu3 }
 0x355   :  { %1640 = vmatpush.msra.mxu0 %v3078_v54  ;;  %v1604_v56 = vpop.f32.mrf.mxu2 }
 0x357   :  { %1641 = vmatpush.msra.mxu0 %v3079_v57 }
 0x358   :  { %v1584_v58 = vpop.f32.mrf.mxu1 }
 0x359   :  { %1642 = vmatpush.msra.mxu0 %v3080_v60 }
 0x35a   :  { %2911 = vmatmul.msk.f32.vlgmr.msrb.gmra.mxu0 %vm146_vm0, %v3935_v59 }
 0x35b   :  { %1719 = vmatpush.msrb.mxu0 %v3081_v61 }
 0x35c   :  { %v1624_v62 = vpop.f32.mrf.mxu3 }
 0x35d   :  { %1720 = vmatpush.msrb.mxu0 %v3082_v0  ;;  %v1684_v1 = vpop.f32.mrf.mxu2 }
 0x35e   :  { %2934 = vmatpush.xpose.msk.msra.mxu2 %vm630_vm1, %v1684_v1 }
 0x35f   :  { %1721 = vmatpush.msrb.mxu0 %v3083_v2 }
 0x360   :  { %v1664_v4 = vpop.f32.mrf.mxu1 }
 0x361   :  { %2932 = vmatpush.xpose.msk.msra.mxu1 %vm630_vm1, %v1664_v4  ;;  %1722 = vmatpush.msrb.mxu0 %v3084_v14 }
 0x362   :  { %2935 = vmatmul.msk.f32.vlgmr.msra.gmra.mxu2 %vm630_vm1, %v1524_v47  ;;  %2915 = vmatmul.msk.f32.vlgmr.msra.gmra.mxu0 %vm146_vm0, %v3935_v59 }
 0x363   :  { %1799 = vmatpush.msra.mxu0 %v3085_v15 }
 0x364   :  { %2933 = vmatmul.msk.f32.vlgmr.msra.gmra.mxu1 %vm630_vm1, %v1504_v49  ;;  %v1704_v7 = vpop.f32.mrf.mxu3 }
 0x365   :  { %2936 = vmatpush.xpose.msk.msra.mxu3 %vm630_vm1, %v1704_v7  ;;  %1800 = vmatpush.msra.mxu0 %v3086_v25 }
 0x366   :  { %v1764_v26 = vpop.f32.mrf.mxu2 }
 0x367   :  { %2942 = vmatpush.xpose.msk.msrb.mxu2 %vm630_vm1, %v1764_v26  ;;  %1801 = vmatpush.msra.mxu0 %v3087_v23 }
 0x368   :  { %v1744_v48 = vpop.f32.mrf.mxu1  ;;  %2937 = vmatmul.msk.f32.vlgmr.msra.gmra.mxu3 %vm630_vm1, %v1544_v53 }
 0x369   :  { %2940 = vmatpush.xpose.msk.msrb.mxu1 %vm630_vm1, %v1744_v48  ;;  %1802 = vmatpush.msra.mxu0 %v3088_v51 }
 0x36a   :  { %2943 = vmatmul.msk.f32.vlgmr.msrb.gmra.mxu2 %vm630_vm1, %v1604_v56  ;;  %2919 = vmatmul.msk.f32.vlgmr.msrb.gmra.mxu0 %vm146_vm0, %v3935_v59 }
 0x36b   :  { %1879 = vmatpush.msrb.mxu0 %v3089_v29 }
 0x36c   :  { %2941 = vmatmul.msk.f32.vlgmr.msrb.gmra.mxu1 %vm630_vm1, %v1584_v58  ;;  %v1784_v40 = vpop.f32.mrf.mxu3 }
 0x36d   :  { %2944 = vmatpush.xpose.msk.msrb.mxu3 %vm630_vm1, %v1784_v40  ;;  %1880 = vmatpush.msrb.mxu0 %v3090_v36 }
 0x36e   :  { %v1844_v28 = vpop.f32.mrf.mxu2 }
 0x36f   :  { %1881 = vmatpush.msrb.mxu0 %v3091_v5  ;;  %2425 = vmatpush.msra.mxu2 %v1844_v28 }
 0x370   :  { %2945 = vmatmul.msk.f32.vlgmr.msrb.gmra.mxu3 %vm630_vm1, %v1624_v62  ;;  %v1824_v31 = vpop.f32.mrf.mxu1 }
 0x371   :  { %1882 = vmatpush.msrb.mxu0 %v3092_v37  ;;  %2402 = vmatpush.msra.mxu1 %v1824_v31 }
 0x372   :  { %2923 = vmatmul.msk.f32.vlgmr.msra.gmra.mxu0 %vm146_vm0, %v3935_v59 }
 0x373   :  { %1959 = vmatpush.msra.mxu0 %v3093_v19 }
 0x374   :  { %v1864_v24 = vpop.f32.mrf.mxu3 }
 0x375   :  { %1960 = vmatpush.msra.mxu0 %v3094_v33  ;;  %2448 = vmatpush.msra.mxu3 %v1864_v24 }
 0x376   :  { %v1924_v34 = vpop.f32.mrf.mxu2 }
 0x377   :  { %1961 = vmatpush.msra.mxu0 %v3095_v17  ;;  %2517 = vmatpush.msrb.mxu2 %v1924_v34 }
 0x378   :  { %v1904_v30 = vpop.f32.mrf.mxu1 }
 0x379   :  { %1962 = vmatpush.msra.mxu0 %v3096_v21  ;;  %2494 = vmatpush.msrb.mxu1 %v1904_v30 }
 0x37a   :  { %2927 = vmatmul.msk.f32.vlgmr.msrb.gmra.mxu0 %vm146_vm0, %v3935_v59 }
 0x37c   :  { %v1944_v38 = vpop.f32.mrf.mxu3 }
 0x37d   :  { %2540 = vmatpush.msrb.mxu3 %v1944_v38 }
 0x382   :  { %2931 = vmatmul.msk.f32.vlgmr.msra.gmra.mxu0 %vm146_vm0, %v3935_v59 }
 0x3cf   :  { %v1458_v32 = vpop.f32.mrf.mxu0 }
 0x3d0   :  { %v1459_v59 = vadd.f32 %v4213_v42, %v1458_v32 }
 0x3d2   :  { %v2906_v39 = vmul.f32 -1.442695, %v1459_v59 }
 0x3d4   :  { %3004 = vpow2.f32 %v2906_v39 }
 0x3d7   :  { %v1564_v43 = vpop.f32.mrf.mxu0 }
 0x3da   :  { %v3005_v47 = vpop.eup %3004 }
 0x3db   :  { %v1464_v49 = vadd.f32 1.0, %v3005_v47 }
 0x3dd   :  { %3006 = vrcp.f32 %v1464_v49  ;;  %v1476_v61 = vand.u32 2147483648, %v1464_v49  ;;  %v1474_v2 = vand.u32 2147483647, %v1464_v49  ;;  %vm1470_vm10 = vweird.f32 %v1464_v49 }
 0x3df   :  { %v1644_v52 = vpop.f32.mrf.mxu0  ;;  %v1477_v7 = vor.u32 1.1754944e-38, %v1476_v61  ;;  %vm1475_vm12 = vcmp.eq.f32.partialorder %v1474_v2, 8.507059e+37 }
 0x3e1   :  { %v1990_v57 = vpop.f32.mrf.mxu1 }
 0x3e2   :  { %v2175_v4 = vmul.f32 0.25, %v1990_v57 }
 0x3e3   :  { %v3007_v53 = vpop.eup %3006 }
 0x3e4   :  { %v1466_v54 = vmul.f32 %v3007_v53, %v1464_v49  ;;  %vm1471_vm9 = vweird.f32 %v3007_v53  ;;  %v2183_v40 = vsel %vm847_vm2, %v2175_v4, -inf }
 0x3e5   :  { %v2016_v56 = vpop.f32.mrf.mxu2  ;;  %vm1472_vm11 = vmor %vm1470_vm10, %vm1471_vm9 }
 0x3e6   :  { %v1467_v58 = vsub.f32 1.0, %v1466_v54  ;;  %v2176_v60 = vmul.f32 0.25, %v2016_v56 }
 0x3e7   :  { %v1724_v62 = vpop.f32.mrf.mxu0 }
 0x3e8   :  { %v1468_v0 = vmul.f32 %v3007_v53, %v1467_v58  ;;  %v2186_v1 = vsel %vm847_vm2, %v2176_v60, -inf  ;;  %2938 = vmatpush.xpose.msk.msrb.mxu0 %vm630_vm1, %v1724_v62 }
 0x3e9   :  { %2187 = vmax.xlane.f32.xlu1 %v2186_v1  ;;  %v2094_v37 = vpop.f32.mrf.mxu1 }
 0x3ea   :  { %v1469_v14 = vadd.f32 %v3007_v53, %v1468_v0  ;;  %v2179_v33 = vmul.f32 0.25, %v2094_v37 }
 0x3eb   :  { %v2042_v15 = vpop.f32.mrf.mxu3  ;;  %2939 = vmatmul.msk.f32.vlgmr.msrb.gmra.mxu0 %vm630_vm1, %v1564_v43 }
 0x3ec   :  { %v2177_v25 = vmul.f32 0.25, %v2042_v15  ;;  %v1473_v26 = vsel %vm1472_vm11, %v3007_v53, %v1469_v14 }
 0x3ed   :  { %v2120_v23 = vpop.f32.mrf.mxu2  ;;  %v1478_v48 = vsel %vm1475_vm12, %v1477_v7, %v1473_v26 }
 0x3ee   :  { %v2180_v51 = vmul.f32 0.25, %v2120_v23  ;;  %v2189_v29 = vsel %vm847_vm2, %v2177_v25, -inf  ;;  %v1480_v36 = vmul.f32 %v1478_v48, %v4122_v50  ;;  %v2195_v50 = vsel %vm847_vm2, %v2179_v33, -inf }
 0x3ef   :  { %2190 = vmax.xlane.f32.xlu2 %v2189_v29  ;;  %v1804_v5 = vpop.f32.mrf.mxu0 }
 0x3f0   :  { %v2198_v19 = vsel %vm847_vm2, %v2180_v51, -inf  ;;  %2946 = vmatpush.xpose.msk.msra.mxu0 %vm630_vm1, %v1804_v5  ;;  %1481 = vst.msk [vmem:[#allocation2] sm:$0xff] %vm146_vm0, %v1480_v36 }
 0x3f1   :  { %2199 = vmax.xlane.f32.xlu0 %v2198_v19  ;;  %2184 = vmax.xlane.f32.xlu1 %v2183_v40 }
 0x3f3   :  { %v2146_v17 = vpop.f32.mrf.mxu3  ;;  %2947 = vmatmul.msk.f32.vlgmr.msra.gmra.mxu0 %vm630_vm1, %v1644_v52 }
 0x3f4   :  { %v2181_v21 = vmul.f32 0.25, %v2146_v17 }
 0x3f6   :  { %v2201_v28 = vsel %vm847_vm2, %v2181_v21, -inf }
 0x3f7   :  { %2202 = vmax.xlane.f32.xlu2 %v2201_v28  ;;  %v1884_v31 = vpop.f32.mrf.mxu0 }
 0x3f8   :  { %2471 = vmatpush.msrb.mxu0 %v1884_v31 }
 0x3f9   :  { %2196 = vmax.xlane.f32.xlu1 %v2195_v50 }
 0x3ff   :  { %v1964_v24 = vpop.f32.mrf.mxu0 }
 0x400   :  { %2563 = vmatpush.msra.mxu0 %v1964_v24 }
 0x45c   :  { %v2188_v34 = vpop.xlane.xlu1 %2187 }
 0x45d   :  { %v2208_v30 = vsub.f32 %v2176_v60, %v2188_v34 }
 0x45f   :  { %v2217_v43 = vmul.f32 1.442695, %v2208_v30 }
 0x462   :  { %v2191_v38 = vpop.xlane.xlu2 %2190 }
 0x463   :  { %v2209_v32 = vsub.f32 %v2177_v25, %v2191_v38 }
 0x464   :  { %v2185_v39 = vpop.xlane.xlu1 %2184  ;;  %v2200_v47 = vpop.xlane.xlu0 %2199 }
 0x465   :  { %v2219_v59 = vmul.f32 1.442695, %v2209_v32  ;;  %v2207_v52 = vsub.f32 %v2175_v4, %v2185_v39  ;;  %v2212_v54 = vsub.f32 %v2180_v51, %v2200_v47 }
 0x467   :  { %3008 = vpow2.f32 %v2219_v59  ;;  %v2215_v60 = vmul.f32 1.442695, %v2207_v52  ;;  %v2225_v0 = vmul.f32 1.442695, %v2212_v54 }
 0x468   :  { %v2068_v49 = vpop.f32.mrf.mxu0  ;;  %3010 = vpow2.f32 %v2217_v43 }
 0x469   :  { %v2178_v53 = vmul.f32 0.25, %v2068_v49 }
 0x46a   :  { %v2203_v56 = vpop.xlane.xlu2 %2202 }
 0x46b   :  { %v2213_v57 = vsub.f32 %v2181_v21, %v2203_v56  ;;  %v2192_v58 = vsel %vm847_vm2, %v2178_v53, -inf }
 0x46c   :  { %2193 = vmax.xlane.f32.xlu0 %v2192_v58  ;;  %v2197_v2 = vpop.xlane.xlu1 %2196 }
 0x46d   :  { %v4229_v61 = vpop.eup %3008  ;;  %v2227_v62 = vmul.f32 1.442695, %v2213_v57  ;;  %v2211_v7 = vsub.f32 %v2179_v33, %v2197_v2 }
 0x46e   :  { %v2237_v1 = vsel %vm847_vm2, %v4229_v61, 0.0  ;;  %v4233_v4 = vpop.eup %3010 }
 0x46f   :  { %3012 = vpow2.f32 %v2227_v62  ;;  %2238 = vadd.xlane.f32.xlu1 %v2237_v1  ;;  %v2234_v25 = vsel %vm847_vm2, %v4233_v4, 0.0  ;;  %v2223_v48 = vmul.f32 1.442695, %v2211_v7 }
 0x470   :  { %v2172_v14 = vpop.f32.mrf.mxu0  ;;  %3014 = vpow2.f32 %v2215_v60 }
 0x471   :  { %v2182_v15 = vmul.f32 0.25, %v2172_v14  ;;  %3016 = vpow2.f32 %v2225_v0 }
 0x472   :  { %3018 = vpow2.f32 %v2223_v48 }
 0x473   :  { %v2204_v26 = vsel %vm847_vm2, %v2182_v15, -inf }
 0x474   :  { %2235 = vadd.xlane.f32.xlu0 %v2234_v25  ;;  %2205 = vmax.xlane.f32.xlu2 %v2204_v26 }
 0x475   :  { %v4238_v23 = vpop.eup %3012 }
 0x476   :  { %v2249_v51 = vsel %vm847_vm2, %v4238_v23, 0.0  ;;  %v4242_v29 = vpop.eup %3014 }
 0x477   :  { %2250 = vadd.xlane.f32.xlu1 %v2249_v51  ;;  %v4244_v40 = vpop.eup %3016  ;;  %v2231_v36 = vsel %vm847_vm2, %v4242_v29, 0.0 }
 0x478   :  { %v2246_v5 = vsel %vm847_vm2, %v4244_v40, 0.0  ;;  %v4250_v37 = vpop.eup %3018 }
 0x479   :  { %v2243_v19 = vsel %vm847_vm2, %v4250_v37, 0.0 }
 0x47c   :  { %2232 = vadd.xlane.f32.xlu0 %v2231_v36  ;;  %2247 = vadd.xlane.f32.xlu2 %v2246_v5 }
 0x484   :  { %2244 = vadd.xlane.f32.xlu0 %v2243_v19 }
 0x4df   :  { %v2194_v33 = vpop.xlane.xlu0 %2193 }
 0x4e0   :  { %v2210_v17 = vsub.f32 %v2178_v53, %v2194_v33 }
 0x4e2   :  { %v2221_v21 = vmul.f32 1.442695, %v2210_v17  ;;  %v2239_v28 = vpop.xlane.xlu1 %2238 }
 0x4e3   :  { %3020 = vrcp.f32 %v2239_v28  ;;  %v2296_v47 = vand.u32 2147483648, %v2239_v28  ;;  %v2294_v53 = vand.u32 2147483647, %v2239_v28  ;;  %vm2290_vm14 = vweird.f32 %v2239_v28 }
 0x4e4   :  { %3022 = vpow2.f32 %v2221_v21 }
 0x4e5   :  { %v2297_v62 = vor.u32 1.1754944e-38, %v2296_v47  ;;  %vm2295_vm3 = vcmp.eq.f32.partialorder %v2294_v53, 8.507059e+37 }
 0x4e7   :  { %v2206_v50 = vpop.xlane.xlu2 %2205  ;;  %v2236_v31 = vpop.xlane.xlu0 %2235 }
 0x4e8   :  { %v2214_v24 = vsub.f32 %v2182_v15, %v2206_v50  ;;  %3024 = vrcp.f32 %v2236_v31  ;;  %v2281_v14 = vand.u32 2147483648, %v2236_v31  ;;  %v2279_v26 = vand.u32 2147483647, %v2236_v31 }
 0x4e9   :  { %v3021_v34 = vpop.eup %3020  ;;  %vm2275_vm5 = vweird.f32 %v2236_v31 }
 0x4ea   :  { %v4254_v30 = vpop.eup %3022  ;;  %v2286_v38 = vmul.f32 %v3021_v34, %v2239_v28  ;;  %v2229_v32 = vmul.f32 1.442695, %v2214_v24  ;;  %v2251_v59 = vpop.xlane.xlu1 %2250  ;;  %vm2291_vm13 = vweird.f32 %v3021_v34  ;;  %v2282_v21 = vor.u32 1.1754944e-38, %v2281_v14 }
 0x4eb   :  { %3026 = vrcp.f32 %v2251_v59  ;;  %v2240_v43 = vsel %vm847_vm2, %v4254_v30, 0.0  ;;  %vm2292_vm15 = vmor %vm2290_vm14, %vm2291_vm13  ;;  %v2354_v51 = vand.u32 2147483647, %v2251_v59  ;;  %v2356_v33 = vand.u32 2147483648, %v2251_v59 }
 0x4ec   :  { %v2287_v39 = vsub.f32 1.0, %v2286_v38  ;;  %3028 = vpow2.f32 %v2229_v32  ;;  %2241 = vadd.xlane.f32.xlu2 %v2240_v43  ;;  %vm2280_vm8 = vcmp.eq.f32.partialorder %v2279_v26, 8.507059e+37  ;;  %vm2350_vm9 = vweird.f32 %v2251_v59 }
 0x4ed   :  { %vm2355_vm10 = vcmp.eq.f32.partialorder %v2354_v51, 8.507059e+37 }
 0x4ee   :  { %v3025_v49 = vpop.eup %3024  ;;  %v2288_v52 = vmul.f32 %v3021_v34, %v2287_v39  ;;  %v2357_v39 = vor.u32 1.1754944e-38, %v2356_v33 }
 0x4ef   :  { %v2271_v54 = vmul.f32 %v3025_v49, %v2236_v31  ;;  %v4258_v56 = vpop.xlane.xlu2 %2247  ;;  %v4260_v57 = vpop.xlane.xlu0 %2232  ;;  %vm2276_vm4 = vweird.f32 %v3025_v49 }
 0x4f0   :  { %v2289_v58 = vadd.f32 %v3021_v34, %v2288_v52  ;;  %3030 = vrcp.f32 %v4258_v56  ;;  %vm2277_vm6 = vmor %vm2275_vm5, %vm2276_vm4  ;;  %v2339_v47 = vand.u32 2147483647, %v4258_v56  ;;  %vm2335_vm14 = vweird.f32 %v4258_v56 }
 0x4f1   :  { %v3027_v60 = vpop.eup %3026  ;;  %v2272_v0 = vsub.f32 1.0, %v2271_v54  ;;  %3032 = vrcp.f32 %v4260_v57 }
 0x4f2   :  { %v4264_v1 = vpop.eup %3028  ;;  %v2293_v2 = vsel %vm2292_vm15, %v3021_v34, %v2289_v58  ;;  %v2346_v15 = vmul.f32 %v3027_v60, %v2251_v59  ;;  %vm2351_vm7 = vweird.f32 %v3027_v60  ;;  %v2266_v58 = vand.u32 2147483648, %v4260_v57 }
 0x4f3   :  { %v2298_v7 = vsel %vm2295_vm3, %v2297_v62, %v2293_v2  ;;  %v2273_v25 = vmul.f32 %v3025_v49, %v2272_v0  ;;  %v2252_v36 = vsel %vm847_vm2, %v4264_v1, 0.0  ;;  %vm2352_vm11 = vmor %vm2350_vm9, %vm2351_vm7  ;;  %v2264_v0 = vand.u32 2147483647, %v4260_v57 }
 0x4f4   :  { %v2347_v48 = vsub.f32 1.0, %v2346_v15  ;;  %v2299_v5 = vmul.f32 %v4229_v61, %v2298_v7  ;;  %2253 = vadd.xlane.f32.xlu1 %v2252_v36  ;;  %vm2260_vm3 = vweird.f32 %v4260_v57  ;;  %vm2340_vm4 = vcmp.eq.f32.partialorder %v2339_v47, 8.507059e+37 }
 0x4f5   :  { %v2274_v19 = vadd.f32 %v3025_v49, %v2273_v25 }
 0x4f6   :  { %v3031_v17 = vpop.eup %3030  ;;  %v2348_v28 = vmul.f32 %v3027_v60, %v2347_v48  ;;  %2378 = vst.msk [vmem:[#allocation4 + $0x50] sm:$0xff] %vm847_vm2, %v2299_v5  ;;  %2950 = vmatmul.msk.f32.vlgmr.msra.gmra.mxu3 %vm847_vm2, %v2299_v5 }
 0x4f7   :  { %v3033_v50 = vpop.eup %3032  ;;  %v2278_v24 = vsel %vm2277_vm6, %v3025_v49, %v2274_v19  ;;  %v2331_v34 = vmul.f32 %v3031_v17, %v4258_v56  ;;  %v4272_v61 = vpop.xlane.xlu0 %2244  ;;  %2631 = vmatpush.msra.mxu3 %v3812_v22  ;;  %v2341_v49 = vand.u32 2147483648, %v4258_v56  ;;  %vm2336_vm12 = vweird.f32 %v3031_v17 }
 0x4f8   :  { %v2283_v31 = vsel %vm2280_vm8, %v2282_v21, %v2278_v24  ;;  %v2349_v38 = vadd.f32 %v3027_v60, %v2348_v28  ;;  %v2256_v32 = vmul.f32 %v3033_v50, %v4260_v57  ;;  %3034 = vrcp.f32 %v4272_v61  ;;  %vm2337_vm15 = vmor %vm2335_vm14, %vm2336_vm12 }
 0x4f9   :  { %v2332_v43 = vsub.f32 1.0, %v2331_v34  ;;  %2632 = vmatpush.msra.mxu3 %v3818_v44  ;;  %v2284_v22 = vmul.f32 %v4233_v4, %v2283_v31  ;;  %vm2261_vm13 = vweird.f32 %v3033_v50  ;;  %v2342_v4 = vor.u32 1.1754944e-38, %v2341_v49 }
 0x4fa   :  { %v2353_v59 = vsel %vm2352_vm11, %v3027_v60, %v2349_v38  ;;  %v2257_v52 = vsub.f32 1.0, %v2256_v32  ;;  %vm2262_vm5 = vmor %vm2260_vm3, %vm2261_vm13  ;;  %vm2265_vm6 = vcmp.eq.f32.partialorder %v2264_v0, 8.507059e+37  ;;  %v2326_v51 = vand.u32 2147483648, %v4272_v61 }
 0x4fb   :  { %v2358_v53 = vsel %vm2355_vm10, %v2357_v39, %v2353_v59  ;;  %v2333_v54 = vmul.f32 %v3031_v17, %v2332_v43  ;;  %2377 = vst.msk [vmem:[#allocation4 + $0x48] sm:$0xff] %vm847_vm2, %v2284_v22  ;;  %2949 = vmatmul.msk.f32.vlgmr.msra.gmra.mxu2 %vm847_vm2, %v2284_v22  ;;  %vm2320_vm8 = vweird.f32 %v4272_v61 }
 0x4fc   :  { %v2258_v62 = vmul.f32 %v3033_v50, %v2257_v52  ;;  %v2359_v44 = vmul.f32 %v4238_v23, %v2358_v53  ;;  %2608 = vmatpush.msra.mxu2 %v3836_v35  ;;  %v2267_v23 = vor.u32 1.1754944e-38, %v2266_v58 }
 0x4fd   :  { %v2334_v60 = vadd.f32 %v3031_v17, %v2333_v54 }
 0x4fe   :  { %v2259_v2 = vadd.f32 %v3033_v50, %v2258_v62  ;;  %2382 = vst.msk [vmem:[#allocation4 + $0x70] sm:$0xff] %vm847_vm2, %v2359_v44  ;;  %2954 = vmatmul.msk.f32.vlgmr.msrb.gmra.mxu3 %vm847_vm2, %v2359_v44  ;;  %v3035_v14 = vpop.eup %3034  ;;  %2609 = vmatpush.msra.mxu2 %v3860_v12 }
 0x4ff   :  { %v2338_v15 = vsel %vm2337_vm15, %v3031_v17, %v2334_v60  ;;  %2723 = vmatpush.msrb.mxu3 %v3829_v55  ;;  %v2316_v7 = vmul.f32 %v3035_v14, %v4272_v61  ;;  %vm2321_vm7 = vweird.f32 %v3035_v14  ;;  %v2324_v55 = vand.u32 2147483647, %v4272_v61 }
 0x500   :  { %v2343_v35 = vsel %vm2340_vm4, %v2342_v4, %v2338_v15  ;;  %v2263_v56 = vsel %vm2262_vm5, %v3033_v50, %v2259_v2  ;;  %vm2322_vm9 = vmor %vm2320_vm8, %vm2321_vm7 }
 0x501   :  { %v2268_v57 = vsel %vm2265_vm6, %v2267_v23, %v2263_v56  ;;  %v2344_v25 = vmul.f32 %v4244_v40, %v2343_v35  ;;  %2724 = vmatpush.msrb.mxu3 %v3853_v27  ;;  %v2317_v26 = vsub.f32 1.0, %v2316_v7  ;;  %v3097_v27 = vld [vmem:[%s4364_s2 + $0x8] sm:$0xff]  ;;  %v2327_v40 = vor.u32 1.1754944e-38, %v2326_v51  ;;  %s3150_s2 = smov [#allocation4]  }
 0x502   :  { %v2269_v48 = vmul.f32 %v4242_v29, %v2268_v57  ;;  %vm2325_vm10 = vcmp.eq.f32.partialorder %v2324_v55, 8.507059e+37  ;;  %s2830_s17 = sshll.u32 %s3150_s2, 4  ;;  %s2831_s17 = int_to_ptr.vmem [resolvable:$true] %s2830_s17 }
 0x503   :  { %2381 = vst.msk [vmem:[#allocation4 + $0x68] sm:$0xff] %vm847_vm2, %v2344_v25  ;;  %v2318_v12 = vmul.f32 %v3035_v14, %v2317_v26  ;;  %2953 = vmatmul.msk.f32.vlgmr.msrb.gmra.mxu2 %vm847_vm2, %v2344_v25 }
 0x504   :  { %2376 = vst.msk [vmem:[#allocation4 + $0x40] sm:$0xff] %vm847_vm2, %v2269_v48  ;;  %2948 = vmatmul.msk.f32.vlgmr.msra.gmra.mxu1 %vm847_vm2, %v2269_v48  ;;  %2700 = vmatpush.msrb.mxu2 %v3879_v3 }
 0x505   :  { %2585 = vmatpush.msra.mxu1 %v3097_v27  ;;  %v2319_v29 = vadd.f32 %v3035_v14, %v2318_v12 }
 0x506   :  { %2701 = vmatpush.msrb.mxu2 %v3891_v63 }
 0x507   :  { %2586 = vmatpush.msra.mxu1 %v3806_v45  ;;  %v2323_v36 = vsel %vm2322_vm9, %v3035_v14, %v2319_v29 }
 0x508   :  { %v2328_v5 = vsel %vm2325_vm10, %v2327_v40, %v2323_v36 }
 0x509   :  { %v2329_v19 = vmul.f32 %v4250_v37, %v2328_v5 }
 0x50b   :  { %2380 = vst.msk [vmem:[#allocation4 + $0x60] sm:$0xff] %vm847_vm2, %v2329_v19 }
 0x50c   :  { %2952 = vmatmul.msk.f32.vlgmr.msrb.gmra.mxu1 %vm847_vm2, %v2329_v19 }
 0x50d   :  { %2677 = vmatpush.msrb.mxu1 %v3846_v10 }
 0x50f   :  { %2678 = vmatpush.msrb.mxu1 %v3865_v13 }
 0x55f   :  { %v2242_v3 = vpop.xlane.xlu2 %2241 }
 0x560   :  { %3036 = vrcp.f32 %v2242_v3  ;;  %v2311_v21 = vand.u32 2147483648, %v2242_v3  ;;  %v2309_v50 = vand.u32 2147483647, %v2242_v3  ;;  %vm2305_vm12 = vweird.f32 %v2242_v3 }
 0x562   :  { %v2312_v34 = vor.u32 1.1754944e-38, %v2311_v21  ;;  %vm2310_vm14 = vcmp.eq.f32.partialorder %v2309_v50, 8.507059e+37 }
 0x566   :  { %v3037_v33 = vpop.eup %3036 }
 0x567   :  { %v2301_v17 = vmul.f32 %v3037_v33, %v2242_v3  ;;  %v2254_v45 = vpop.xlane.xlu1 %2253  ;;  %vm2306_vm11 = vweird.f32 %v3037_v33 }
 0x568   :  { %3038 = vrcp.f32 %v2254_v45  ;;  %vm2307_vm13 = vmor %vm2305_vm12, %vm2306_vm11  ;;  %v2371_v32 = vand.u32 2147483648, %v2254_v45  ;;  %v2369_v43 = vand.u32 2147483647, %v2254_v45  ;;  %vm2365_vm3 = vweird.f32 %v2254_v45 }
 0x569   :  { %v2302_v63 = vsub.f32 1.0, %v2301_v17 }
 0x56a   :  { %v2372_v59 = vor.u32 1.1754944e-38, %v2371_v32  ;;  %vm2370_vm5 = vcmp.eq.f32.partialorder %v2369_v43, 8.507059e+37 }
 0x56b   :  { %v2303_v28 = vmul.f32 %v3037_v33, %v2302_v63 }
 0x56d   :  { %v2304_v37 = vadd.f32 %v3037_v33, %v2303_v28 }
 0x56e   :  { %v3039_v24 = vpop.eup %3038 }
 0x56f   :  { %v2308_v61 = vsel %vm2307_vm13, %v3037_v33, %v2304_v37  ;;  %v2361_v10 = vmul.f32 %v3039_v24, %v2254_v45  ;;  %vm2366_vm15 = vweird.f32 %v3039_v24 }
 0x570   :  { %v2313_v13 = vsel %vm2310_vm14, %v2312_v34, %v2308_v61  ;;  %vm2367_vm4 = vmor %vm2365_vm3, %vm2366_vm15 }
 0x571   :  { %v2314_v31 = vmul.f32 %v4254_v30, %v2313_v13  ;;  %v2362_v38 = vsub.f32 1.0, %v2361_v10 }
 0x573   :  { %2379 = vst.msk [vmem:[#allocation4 + $0x58] sm:$0xff] %vm847_vm2, %v2314_v31  ;;  %v2363_v39 = vmul.f32 %v3039_v24, %v2362_v38  ;;  %2951 = vmatmul.msk.f32.vlgmr.msrb.gmra.mxu0 %vm847_vm2, %v2314_v31 }
 0x574   :  { %2654 = vmatpush.msrb.mxu0 %v3824_v16 }
 0x575   :  { %v2364_v47 = vadd.f32 %v3039_v24, %v2363_v39 }
 0x576   :  { %2655 = vmatpush.msrb.mxu0 %v3841_v41 }
 0x577   :  { %v2368_v49 = vsel %vm2367_vm4, %v3039_v24, %v2364_v47 }
 0x578   :  { %v2373_v30 = vsel %vm2370_vm5, %v2372_v59, %v2368_v49 }
 0x579   :  { %v2450_v52 = vpop.f32.mrf.mxu3  ;;  %v2374_v22 = vmul.f32 %v4264_v1, %v2373_v30 }
 0x57a   :  { %2958 = vmatmul.msk.f32.vlgmr.msra.gmra.mxu3 %vm630_vm1, %v2450_v52 }
 0x57b   :  { %2383 = vst.msk [vmem:[#allocation4 + $0x78] sm:$0xff] %vm847_vm2, %v2374_v22  ;;  %2955 = vmatmul.msk.f32.vlgmr.msra.gmra.mxu0 %vm847_vm2, %v2374_v22 }
 0x57c   :  { %2746 = vmatpush.msra.mxu0 %v3870_v18  ;;  %2838 = dma.vmem_to_hbm [thread:$0]  %s2831_s17, 2048, %s2833_s20, [#allocation5], %s3151_s21, %s3151_s21, %s3152_s22  }
 0x57e   :  { %v2427_v16 = vpop.f32.mrf.mxu2  ;;  %2747 = vmatpush.msra.mxu0 %v3884_v20 }
 0x57f   :  { %2957 = vmatmul.msk.f32.vlgmr.msra.gmra.mxu2 %vm630_vm1, %v2427_v16 }
 0x581   :  { %v2404_v41 = vpop.f32.mrf.mxu1  ;;  %v2542_v53 = vpop.f32.mrf.mxu3 }
 0x582   :  { %2956 = vmatmul.msk.f32.vlgmr.msra.gmra.mxu1 %vm630_vm1, %v2404_v41  ;;  %2962 = vmatmul.msk.f32.vlgmr.msrb.gmra.mxu3 %vm630_vm1, %v2542_v53 }
 0x583   :  { %2783 = vmatpush.msra.mxu1 %v4075_v6 }
 0x585   :  { %2784 = vmatpush.msra.mxu1 %v4081_v8 }
 0x586   :  { %v2519_v1 = vpop.f32.mrf.mxu2 }
 0x587   :  { %2785 = vmatpush.msra.mxu1 %v4087_v9  ;;  %2961 = vmatmul.msk.f32.vlgmr.msrb.gmra.mxu2 %vm630_vm1, %v2519_v1 }
 0x589   :  { %v2496_v18 = vpop.f32.mrf.mxu1  ;;  %2786 = vmatpush.msra.mxu1 %v4092_v11 }
 0x58a   :  { %2960 = vmatmul.msk.f32.vlgmr.msrb.gmra.mxu1 %vm630_vm1, %v2496_v18 }
 0x5f0   :  { %v2473_v20 = vpop.f32.mrf.mxu0 }
 0x5f1   :  { %2959 = vmatmul.msk.f32.vlgmr.msrb.gmra.mxu0 %vm630_vm1, %v2473_v20 }
 0x5f8   :  { %v2565_v54 = vpop.f32.mrf.mxu0 }
 0x5f9   :  { %2963 = vmatmul.msk.f32.vlgmr.msra.gmra.mxu0 %vm630_vm1, %v2565_v54 }
 0x5fd   :  { %v2634_v62 = vpop.f32.mrf.mxu3 }
 0x5fe   :  { %v2755_v44 = vsel %vm146_vm0, %v2634_v62, 0.0 }
 0x5ff   :  { %v2588_v58 = vpop.f32.mrf.mxu1 }
 0x600   :  { %v2752_v9 = vsel %vm146_vm0, %v2588_v58, 0.0 }
 0x602   :  { %v2611_v6 = vpop.f32.mrf.mxu2 }
 0x603   :  { %v2753_v8 = vsel %vm146_vm0, %v2611_v6, 0.0 }
 0x604   :  { %v2754_v0 = vadd.f32 %v2753_v8, %v2752_v9 }
 0x605   :  { %v2726_v35 = vpop.f32.mrf.mxu3 }
 0x606   :  { %v2756_v4 = vadd.f32 %v2755_v44, %v2754_v0  ;;  %v2763_v25 = vsel %vm146_vm0, %v2726_v35, 0.0 }
 0x607   :  { %v2680_v60 = vpop.f32.mrf.mxu1 }
 0x608   :  { %v2759_v23 = vsel %vm146_vm0, %v2680_v60, 0.0 }
 0x60a   :  { %v2703_v14 = vpop.f32.mrf.mxu2 }
 0x60b   :  { %v2761_v7 = vsel %vm146_vm0, %v2703_v14, 0.0 }
 0x66e   :  { %v2657_v11 = vpop.f32.mrf.mxu0 }
 0x66f   :  { %v2757_v2 = vsel %vm146_vm0, %v2657_v11, 0.0 }
 0x670   :  { %v2758_v15 = vadd.f32 %v2757_v2, %v2756_v4 }
 0x672   :  { %v2760_v56 = vadd.f32 %v2759_v23, %v2758_v15 }
 0x674   :  { %v2762_v57 = vadd.f32 %v2761_v7, %v2760_v56 }
 0x676   :  { %v2749_v26 = vpop.f32.mrf.mxu0  ;;  %v2764_v48 = vadd.f32 %v2763_v25, %v2762_v57 }
 0x677   :  { %v2765_v51 = vsel %vm146_vm0, %v2749_v26, 0.0 }
 0x678   :  { %v2766_v12 = vadd.f32 %v2765_v51, %v2764_v48 }
 0x67a   :  { %v2767_v55 = vadd.f32 %v4118_v46, %v2766_v12 }
 0x67c   :  { %2964 = vmatmul.msk.f32.vlgmr.msra.gmra.mxu1 %vm146_vm0, %v2767_v55 }
 0x6f9   :  { %v2788_v27 = vpop.f32.mrf.mxu1 }
 0x6fa   :  { %v2789_v29 = vadd.f32 %v4213_v42, %v2788_v27 }
 0x6fc   :  { %v2965_v46 = vmul.f32 -1.442695, %v2789_v29 }
 0x6fe   :  { %3040 = vpow2.f32 %v2965_v46 }
 0x704   :  { %v3041_v40 = vpop.eup %3040 }
 0x705   :  { %v2794_v36 = vadd.f32 1.0, %v3041_v40 }
 0x707   :  { %3042 = vrcp.f32 %v2794_v36  ;;  %v2806_v33 = vand.u32 2147483648, %v2794_v36  ;;  %v2804_v45 = vand.u32 2147483647, %v2794_v36  ;;  %vm2800_vm2 = vweird.f32 %v2794_v36 }
 0x709   :  { %v2807_v21 = vor.u32 1.1754944e-38, %v2806_v33  ;;  %vm2805_vm7 = vcmp.eq.f32.partialorder %v2804_v45, 8.507059e+37 }
 0x70d   :  { %v3043_v5 = vpop.eup %3042 }
 0x70e   :  { %v2796_v19 = vmul.f32 %v3043_v5, %v2794_v36  ;;  %vm2801_vm1 = vweird.f32 %v3043_v5 }
 0x70f   :  { %vm2802_vm6 = vmor %vm2800_vm2, %vm2801_vm1 }
 0x710   :  { %v2797_v3 = vsub.f32 1.0, %v2796_v19 }
 0x712   :  { %v2798_v17 = vmul.f32 %v3043_v5, %v2797_v3 }
 0x714   :  { %v2799_v63 = vadd.f32 %v3043_v5, %v2798_v17 }
 0x716   :  { %v2803_v42 = vsel %vm2802_vm6, %v3043_v5, %v2799_v63 }
 0x717   :  { %v2808_v28 = vsel %vm2805_vm7, %v2807_v21, %v2803_v42 }
 0x718   :  { %v2810_v50 = vmul.f32 %v2808_v28, %v2767_v55 }
 0x71a   :  { %2812 = vst.msk [vmem:[#allocation2 + $0x8] sm:$0xff] %vm146_vm0, %v2810_v50 }
 0x71b   :  { %2825 = dma.vmem_to_hbm [thread:$0]  %s2818_s4, 256, %s2820_s25, [#allocation3], %s3151_s21, %s3151_s21, %s3152_s22  }
 0x71c   :  { %3146 = dma.done.wait [#allocation3], 256  }
 0x71d   :  { %3147 = vsyncadd [#allocation3], 4294967040 }
 0x71e   :  { %3148 = dma.done.wait [#allocation5], 2048  }
 0x71f   :  { %3149 = vsyncadd [#allocation5], 4294965248 }
 0x720   :  { %2847 = vsyncpa [#allocation3], 1 }
 0x721   :  { %2848 = vsyncpa [#allocation5], 1 }

</bundles_post_ra>
